<compile_context>
chip_gen: v5e
topology: v5e:2x2
jax: 0.10.0
libtpu: 0.0.40
codegen_flags: <defaults>
</compile_context>

<pallas_src>
import functools

import jax
import jax.numpy as jnp
from jax.experimental import pallas as pl
from jax.experimental.pallas import tpu as pltpu


def _round_up(x, m):
    return ((x + m - 1) // m) * m


def _pick_tile(dim, candidates):
    for c in candidates:
        if c <= dim and dim % c == 0:
            return c
    return dim


# ---------------------------------------------------------------------------
# Recurrence kernel: h_t = tanh(gather(W_ih^T, tok_t) + h_{t-1} @ W_hh^T + b)
# ---------------------------------------------------------------------------
def rnn_recurrence_kernel(tok_ref, h0_ref, wih_t_ref, whh_t_ref, b_ref,
                          y_ref, hT_ref, h_scratch,
                          *, steps_per_block, b_pad):
    blk = pl.program_id(0)

    @pl.when(blk == 0)
    def _():
        h_scratch[...] = h0_ref[...]

    h_pad = whh_t_ref.shape[1]
    # Hoist the bias broadcast out of the time loop.
    bias = jnp.broadcast_to(b_ref[...], (b_pad, h_pad))

    def step(s, h):
        t = blk * steps_per_block + s
        # Token-id gather of W_ih^T rows replaces the one-hot matmul.
        rows = []
        for b in range(b_pad):
            tok = tok_ref[t * b_pad + b]                 # scalar from SMEM
            rows.append(wih_t_ref[pl.ds(tok, 1), :])     # (1, H_pad)
        x_emb = jnp.concatenate(rows, axis=0)            # (B_pad, H_pad)

        h_new = jnp.tanh(
            x_emb
            + jnp.dot(h, whh_t_ref[...], preferred_element_type=jnp.float32)
            + bias)
        y_ref[s] = h_new
        return h_new

    h_last = jax.lax.fori_loop(0, steps_per_block, step, h_scratch[...],
                               unroll=True)
    h_scratch[...] = h_last

    # Final-state output block is grid-resident; write it once, at the end.
    @pl.when(blk == pl.num_programs(0) - 1)
    def _():
        hT_ref[...] = h_last


# ---------------------------------------------------------------------------
# Decoder kernel: logits = Y_flat @ W_d^T + b_d   (parallel, lane-dense tiles)
# ---------------------------------------------------------------------------
def decoder_kernel(y_ref, wd_t_ref, bd_ref, o_ref):
    o_ref[...] = (jnp.dot(y_ref[...], wd_t_ref[...],
                          preferred_element_type=jnp.float32)
                  + bd_ref[...])


def rnn_model_forward(inputs, state, params, vocab_size, steps_per_block=None):
    """inputs: (B, T) int tokens; state: (1, B, H) f32.

    Returns (logits (T*B, V), final_state (1, B, H)) matching
    torch RNNModel.forward semantics (time-major stacking of one-hot inputs).
    """
    w_ih, w_hh, b_ih, b_hh, w_d, b_d = params
    B, T = inputs.shape
    H = w_hh.shape[0]
    V = vocab_size

    # (8, 128)-aligned padded sizes.
    B_pad = _round_up(B, 8)
    H_pad = _round_up(H, 128)
    V_pad = _round_up(V, 128)

    # Time steps per grid iteration (must divide T).
    if steps_per_block is None:
        steps_per_block = T if T <= 32 else 8
    while T % steps_per_block:
        steps_per_block -= 1
    S = steps_per_block

    f32 = jnp.float32
    # --- Glue: pad + pre-transpose parameters, fold biases -----------------
    wih_t = jnp.zeros((V_pad, H_pad), f32).at[:V, :H].set(w_ih.T)
    whh_t = jnp.zeros((H_pad, H_pad), f32).at[:H, :H].set(w_hh.T)
    bias = jnp.zeros((1, H_pad), f32).at[0, :H].set(b_ih + b_hh)
    wd_t = jnp.zeros((H_pad, V_pad), f32).at[:H, :V].set(w_d.T)
    bd = jnp.zeros((1, V_pad), f32).at[0, :V].set(b_d)
    h0 = jnp.zeros((B_pad, H_pad), f32).at[:B, :H].set(state[0])

    # Token ids, time-major, batch padded with 0, flattened for SMEM prefetch.
    tok = jnp.zeros((T, B_pad), jnp.int32).at[:, :B].set(
        inputs.T.astype(jnp.int32))
    tok_flat = tok.reshape(T * B_pad)

    # --- Pass 1: sequential recurrence -> hidden states Y -------------------
    rec_kernel = functools.partial(
        rnn_recurrence_kernel, steps_per_block=S, b_pad=B_pad)

    y_pad, hT_pad = pl.pallas_call(
        rec_kernel,
        out_shape=(
            jax.ShapeDtypeStruct((T, B_pad, H_pad), f32),
            jax.ShapeDtypeStruct((B_pad, H_pad), f32),
        ),
        grid_spec=pltpu.PrefetchScalarGridSpec(
            num_scalar_prefetch=1,
            grid=(T // S,),
            in_specs=[
                pl.BlockSpec((B_pad, H_pad), lambda i, tok: (0, 0)),   # h0
                pl.BlockSpec((V_pad, H_pad), lambda i, tok: (0, 0)),   # W_ih^T
                pl.BlockSpec((H_pad, H_pad), lambda i, tok: (0, 0)),   # W_hh^T
                pl.BlockSpec((1, H_pad), lambda i, tok: (0, 0)),       # bias
            ],
            out_specs=[
                pl.BlockSpec((S, B_pad, H_pad), lambda i, tok: (i, 0, 0)),  # Y
                pl.BlockSpec((B_pad, H_pad), lambda i, tok: (0, 0)),        # hT
            ],
            scratch_shapes=[pltpu.VMEM((B_pad, H_pad), f32)],
        ),
        compiler_params=pltpu.CompilerParams(
            dimension_semantics=("arbitrary",)),   # serial recurrence in time
    )(tok_flat, h0, wih_t, whh_t, bias)

    # --- Pass 2: dense decoder as a parallel, lane-dense tiled matmul -------
    M = T * B_pad
    y_flat = y_pad.reshape(M, H_pad)
    tm = _pick_tile(M, (512, 256, 128, 64, 32, 16, 8))
    tn = _pick_tile(V_pad, (512, 256, 128))
    # NOTE: for v6e/v7x, casting wd_t (and y_flat) to bf16 with f32
    # accumulation would double MXU throughput and halve VMEM footprint.

    logits_pad = pl.pallas_call(
        decoder_kernel,
        out_shape=jax.ShapeDtypeStruct((M, V_pad), f32),
        grid_spec=pltpu.PrefetchScalarGridSpec(
            num_scalar_prefetch=0,
            grid=(M // tm, V_pad // tn),
            in_specs=[
                pl.BlockSpec((tm, H_pad), lambda i, j: (i, 0)),   # Y rows
                pl.BlockSpec((H_pad, tn), lambda i, j: (0, j)),   # W_d^T cols
                pl.BlockSpec((1, tn), lambda i, j: (0, j)),       # b_d
            ],
            out_specs=pl.BlockSpec((tm, tn), lambda i, j: (i, j)),
        ),
        compiler_params=pltpu.CompilerParams(
            dimension_semantics=("parallel", "parallel")),
    )(y_flat, wd_t, bd)

    # --- Glue: strip padding back to the module's shapes --------------------
    logits = logits_pad.reshape(T, B_pad, V_pad)[:, :B, :V].reshape(T * B, V)
    h_final = hT_pad[:B, :H][None]
    return logits, h_final


def reference_forward(inputs, state, params, vocab_size):
    """Pure-JAX reference with identical semantics (for validation)."""
    w_ih, w_hh, b_ih, b_hh, w_d, b_d = params
    x = jax.nn.one_hot(inputs.T, vocab_size, dtype=jnp.float32)   # (T, B, V)
    h = state[0]
    ys = []
    for t in range(x.shape[0]):
        h = jnp.tanh(x[t] @ w_ih.T + b_ih + h @ w_hh.T + b_hh)
        ys.append(h)
    y = jnp.stack(ys)                                             # (T, B, H)
    out = y.reshape(-1, y.shape[-1]) @ w_d.T + b_d
    return out, h[None]


if __name__ == "__main__":
    B, T, V, H = 4, 8, 16, 32   # batch, seq_len, vocab_size, hidden_size

    key = jax.random.PRNGKey(0)
    k1, k2, k3, k4, k5, k6, k7, k8 = jax.random.split(key, 8)

    # Deterministic synthetic parameters (shapes follow nn.RNN / nn.Linear).
    scale = 0.1
    w_ih = scale * jax.random.normal(k1, (H, V), jnp.float32)   # rnn.weight_ih_l0
    w_hh = scale * jax.random.normal(k2, (H, H), jnp.float32)   # rnn.weight_hh_l0
    b_ih = scale * jax.random.normal(k3, (H,), jnp.float32)     # rnn.bias_ih_l0
    b_hh = scale * jax.random.normal(k4, (H,), jnp.float32)     # rnn.bias_hh_l0
    w_d = scale * jax.random.normal(k5, (V, H), jnp.float32)    # dense.weight
    b_d = scale * jax.random.normal(k6, (V,), jnp.float32)      # dense.bias
    params = (w_ih, w_hh, b_ih, b_hh, w_d, b_d)

    inputs = jax.random.randint(k7, (B, T), 0, V, dtype=jnp.int32)
    state = scale * jax.random.normal(k8, (1, B, H), jnp.float32)

    out, h_final = rnn_model_forward(inputs, state, params, V)
    out = jax.block_until_ready(out)
    h_final = jax.block_until_ready(h_final)

    ref_out, ref_h = reference_forward(inputs, state, params, V)
    assert out.shape == (T * B, V) and h_final.shape == (1, B, H)
    assert jnp.allclose(out, ref_out, atol=1e-4, rtol=1e-4)
    assert jnp.allclose(h_final, ref_h, atol=1e-4, rtol=1e-4)

    print("KERNEL_OK")
</pallas_src>

<mosaic_0001>
module attributes {stable_mosaic.version = 11 : i64} {
  func.func @rnn_recurrence_kernel(%arg0: i32, %arg1: memref<64xi32, #tpu.memory_space<smem>>, %arg2: memref<8x128xf32, #tpu.memory_space<vmem>>, %arg3: memref<128x128xf32, #tpu.memory_space<vmem>>, %arg4: memref<128x128xf32, #tpu.memory_space<vmem>>, %arg5: memref<1x128xf32, #tpu.memory_space<vmem>>, %arg6: memref<8x8x128xf32, #tpu.memory_space<vmem>>, %arg7: memref<8x128xf32, #tpu.memory_space<vmem>>, %arg8: memref<8x128xf32, #tpu.memory_space<vmem>>) attributes {dimension_semantics = [#tpu.dimension_semantics<arbitrary>], iteration_bounds = array<i64: 1>, scalar_prefetch = 1 : i64, scratch_operands = 1 : i64, tpu.core_type = #tpu.core_type<tc>, window_params = [{pipeline_mode = #tpu.pipeline_mode<synchronous>, transform_indices = @transform_0, window_bounds = array<i64: 8, 128>}, {pipeline_mode = #tpu.pipeline_mode<synchronous>, transform_indices = @transform_1, window_bounds = array<i64: 128, 128>}, {pipeline_mode = #tpu.pipeline_mode<synchronous>, transform_indices = @transform_2, window_bounds = array<i64: 128, 128>}, {pipeline_mode = #tpu.pipeline_mode<synchronous>, transform_indices = @transform_3, window_bounds = array<i64: 1, 128>}, {transform_indices = @transform_4, window_bounds = array<i64: 8, 8, 128>}, {pipeline_mode = #tpu.pipeline_mode<synchronous>, transform_indices = @transform_5, window_bounds = array<i64: 8, 128>}]} {
    %c0_i32 = arith.constant 0 : i32
    %0 = arith.cmpi eq, %arg0, %c0_i32 : i32
    %1 = arith.extui %0 : i1 to i32
    %c0_i32_0 = arith.constant 0 : i32
    %2 = arith.cmpi ne, %1, %c0_i32_0 : i32
    scf.if %2 {
      %c0_248 = arith.constant 0 : index
      %c0_249 = arith.constant 0 : index
      %491 = vector.load %arg2[%c0_248, %c0_249] : memref<8x128xf32, #tpu.memory_space<vmem>>, vector<8x128xf32>
      %c0_250 = arith.constant 0 : index
      %c0_251 = arith.constant 0 : index
      %492 = vector.load %arg8[%c0_250, %c0_251] : memref<8x128xf32, #tpu.memory_space<vmem>>, vector<8x128xf32>
      tpu.vector_store %arg8[%c0_250, %c0_251], %491 {strides = array<i32>} : memref<8x128xf32, #tpu.memory_space<vmem>>, vector<8x128xf32>,
    } else {
    }
    %c0 = arith.constant 0 : index
    %c0_1 = arith.constant 0 : index
    %3 = vector.load %arg5[%c0, %c0_1] : memref<1x128xf32, #tpu.memory_space<vmem>>, vector<1x128xf32>
    %4 = vector.shape_cast %3 : vector<1x128xf32> to vector<1x128xf32>
    %5 = vector.broadcast %4 : vector<1x128xf32> to vector<8x128xf32>
    %c0_2 = arith.constant 0 : index
    %c0_3 = arith.constant 0 : index
    %6 = vector.load %arg8[%c0_2, %c0_3] : memref<8x128xf32, #tpu.memory_space<vmem>>, vector<8x128xf32>
    %c0_i32_4 = arith.constant 0 : i32
    %c8_i32 = arith.constant 8 : i32
    %7 = arith.muli %arg0, %c8_i32 : i32
    %8 = arith.addi %7, %c0_i32_4 : i32
    %c8_i32_5 = arith.constant 8 : i32
    %9 = arith.muli %8, %c8_i32_5 : i32
    %c0_i32_6 = arith.constant 0 : i32
    %10 = arith.addi %9, %c0_i32_6 : i32
    %11 = arith.index_cast %10 : i32 to index
    %12 = memref.load %arg1[%11] : memref<64xi32, #tpu.memory_space<smem>>
    %13 = arith.index_cast %12 : i32 to index
    %c0_7 = arith.constant 0 : index
    %14 = vector.load %arg3[%13, %c0_7] : memref<128x128xf32, #tpu.memory_space<vmem>>, vector<1x128xf32>
    %c8_i32_8 = arith.constant 8 : i32
    %15 = arith.muli %8, %c8_i32_8 : i32
    %c1_i32 = arith.constant 1 : i32
    %16 = arith.addi %15, %c1_i32 : i32
    %17 = arith.index_cast %16 : i32 to index
    %18 = memref.load %arg1[%17] : memref<64xi32, #tpu.memory_space<smem>>
    %19 = arith.index_cast %18 : i32 to index
    %c0_9 = arith.constant 0 : index
    %20 = vector.load %arg3[%19, %c0_9] : memref<128x128xf32, #tpu.memory_space<vmem>>, vector<1x128xf32>
    %c8_i32_10 = arith.constant 8 : i32
    %21 = arith.muli %8, %c8_i32_10 : i32
    %c2_i32 = arith.constant 2 : i32
    %22 = arith.addi %21, %c2_i32 : i32
    %23 = arith.index_cast %22 : i32 to index
    %24 = memref.load %arg1[%23] : memref<64xi32, #tpu.memory_space<smem>>
    %25 = arith.index_cast %24 : i32 to index
    %c0_11 = arith.constant 0 : index
    %26 = vector.load %arg3[%25, %c0_11] : memref<128x128xf32, #tpu.memory_space<vmem>>, vector<1x128xf32>
    %c8_i32_12 = arith.constant 8 : i32
    %27 = arith.muli %8, %c8_i32_12 : i32
    %c3_i32 = arith.constant 3 : i32
    %28 = arith.addi %27, %c3_i32 : i32
    %29 = arith.index_cast %28 : i32 to index
    %30 = memref.load %arg1[%29] : memref<64xi32, #tpu.memory_space<smem>>
    %31 = arith.index_cast %30 : i32 to index
    %c0_13 = arith.constant 0 : index
    %32 = vector.load %arg3[%31, %c0_13] : memref<128x128xf32, #tpu.memory_space<vmem>>, vector<1x128xf32>
    %c8_i32_14 = arith.constant 8 : i32
    %33 = arith.muli %8, %c8_i32_14 : i32
    %c4_i32 = arith.constant 4 : i32
    %34 = arith.addi %33, %c4_i32 : i32
    %35 = arith.index_cast %34 : i32 to index
    %36 = memref.load %arg1[%35] : memref<64xi32, #tpu.memory_space<smem>>
    %37 = arith.index_cast %36 : i32 to index
    %c0_15 = arith.constant 0 : index
    %38 = vector.load %arg3[%37, %c0_15] : memref<128x128xf32, #tpu.memory_space<vmem>>, vector<1x128xf32>
    %c8_i32_16 = arith.constant 8 : i32
    %39 = arith.muli %8, %c8_i32_16 : i32
    %c5_i32 = arith.constant 5 : i32
    %40 = arith.addi %39, %c5_i32 : i32
    %41 = arith.index_cast %40 : i32 to index
    %42 = memref.load %arg1[%41] : memref<64xi32, #tpu.memory_space<smem>>
    %43 = arith.index_cast %42 : i32 to index
    %c0_17 = arith.constant 0 : index
    %44 = vector.load %arg3[%43, %c0_17] : memref<128x128xf32, #tpu.memory_space<vmem>>, vector<1x128xf32>
    %c8_i32_18 = arith.constant 8 : i32
    %45 = arith.muli %8, %c8_i32_18 : i32
    %c6_i32 = arith.constant 6 : i32
    %46 = arith.addi %45, %c6_i32 : i32
    %47 = arith.index_cast %46 : i32 to index
    %48 = memref.load %arg1[%47] : memref<64xi32, #tpu.memory_space<smem>>
    %49 = arith.index_cast %48 : i32 to index
    %c0_19 = arith.constant 0 : index
    %50 = vector.load %arg3[%49, %c0_19] : memref<128x128xf32, #tpu.memory_space<vmem>>, vector<1x128xf32>
    %c8_i32_20 = arith.constant 8 : i32
    %51 = arith.muli %8, %c8_i32_20 : i32
    %c7_i32 = arith.constant 7 : i32
    %52 = arith.addi %51, %c7_i32 : i32
    %53 = arith.index_cast %52 : i32 to index
    %54 = memref.load %arg1[%53] : memref<64xi32, #tpu.memory_space<smem>>
    %55 = arith.index_cast %54 : i32 to index
    %c0_21 = arith.constant 0 : index
    %56 = vector.load %arg3[%55, %c0_21] : memref<128x128xf32, #tpu.memory_space<vmem>>, vector<1x128xf32>
    %57 = tpu.concatenate %14, %20, %26, %32, %38, %44, %50, %56 in 0 : vector<1x128xf32>, vector<1x128xf32>, vector<1x128xf32>, vector<1x128xf32>, vector<1x128xf32>, vector<1x128xf32>, vector<1x128xf32>, vector<1x128xf32> -> vector<8x128xf32>
    %c0_22 = arith.constant 0 : index
    %c0_23 = arith.constant 0 : index
    %58 = vector.load %arg4[%c0_22, %c0_23] : memref<128x128xf32, #tpu.memory_space<vmem>>, vector<128x128xf32>
    %cst = arith.constant dense<0.000000e+00> : vector<8x128xf32>
    %59 = tpu.matmul %6, %58, %cst {dimension_numbers = #tpu.dot_dimension_numbers<[1], [0], [0], [1], [0, 0, 1, 1], [], []>} : vector<8x128xf32>, vector<128x128xf32>, vector<8x128xf32> -> vector<8x128xf32>
    %60 = arith.addf %57, %59 : vector<8x128xf32>
    %61 = arith.addf %60, %5 : vector<8x128xf32>
    %62 = math.tanh %61 : vector<8x128xf32>
    %63 = arith.index_cast %c0_i32_4 : i32 to index
    %c0_24 = arith.constant 0 : index
    %c0_25 = arith.constant 0 : index
    %64 = vector.load %arg6[%63, %c0_24, %c0_25] : memref<8x8x128xf32, #tpu.memory_space<vmem>>, vector<1x8x128xf32>
    %65 = vector.shape_cast %64 : vector<1x8x128xf32> to vector<8x128xf32>
    %66 = vector.shape_cast %62 : vector<8x128xf32> to vector<1x8x128xf32>
    tpu.vector_store %arg6[%63, %c0_24, %c0_25], %66 {strides = array<i32>} : memref<8x8x128xf32, #tpu.memory_space<vmem>>, vector<1x8x128xf32>,
    %c1_i32_26 = arith.constant 1 : i32
    %c8_i32_27 = arith.constant 8 : i32
    %67 = arith.muli %arg0, %c8_i32_27 : i32
    %68 = arith.addi %67, %c1_i32_26 : i32
    %c8_i32_28 = arith.constant 8 : i32
    %69 = arith.muli %68, %c8_i32_28 : i32
    %c0_i32_29 = arith.constant 0 : i32
    %70 = arith.addi %69, %c0_i32_29 : i32
    %71 = arith.index_cast %70 : i32 to index
    %72 = memref.load %arg1[%71] : memref<64xi32, #tpu.memory_space<smem>>
    %73 = arith.index_cast %72 : i32 to index
    %c0_30 = arith.constant 0 : index
    %74 = vector.load %arg3[%73, %c0_30] : memref<128x128xf32, #tpu.memory_space<vmem>>, vector<1x128xf32>
    %c8_i32_31 = arith.constant 8 : i32
    %75 = arith.muli %68, %c8_i32_31 : i32
    %c1_i32_32 = arith.constant 1 : i32
    %76 = arith.addi %75, %c1_i32_32 : i32
    %77 = arith.index_cast %76 : i32 to index
    %78 = memref.load %arg1[%77] : memref<64xi32, #tpu.memory_space<smem>>
    %79 = arith.index_cast %78 : i32 to index
    %c0_33 = arith.constant 0 : index
    %80 = vector.load %arg3[%79, %c0_33] : memref<128x128xf32, #tpu.memory_space<vmem>>, vector<1x128xf32>
    %c8_i32_34 = arith.constant 8 : i32
    %81 = arith.muli %68, %c8_i32_34 : i32
    %c2_i32_35 = arith.constant 2 : i32
    %82 = arith.addi %81, %c2_i32_35 : i32
    %83 = arith.index_cast %82 : i32 to index
    %84 = memref.load %arg1[%83] : memref<64xi32, #tpu.memory_space<smem>>
    %85 = arith.index_cast %84 : i32 to index
    %c0_36 = arith.constant 0 : index
    %86 = vector.load %arg3[%85, %c0_36] : memref<128x128xf32, #tpu.memory_space<vmem>>, vector<1x128xf32>
    %c8_i32_37 = arith.constant 8 : i32
    %87 = arith.muli %68, %c8_i32_37 : i32
    %c3_i32_38 = arith.constant 3 : i32
    %88 = arith.addi %87, %c3_i32_38 : i32
    %89 = arith.index_cast %88 : i32 to index
    %90 = memref.load %arg1[%89] : memref<64xi32, #tpu.memory_space<smem>>
    %91 = arith.index_cast %90 : i32 to index
    %c0_39 = arith.constant 0 : index
    %92 = vector.load %arg3[%91, %c0_39] : memref<128x128xf32, #tpu.memory_space<vmem>>, vector<1x128xf32>
    %c8_i32_40 = arith.constant 8 : i32
    %93 = arith.muli %68, %c8_i32_40 : i32
    %c4_i32_41 = arith.constant 4 : i32
    %94 = arith.addi %93, %c4_i32_41 : i32
    %95 = arith.index_cast %94 : i32 to index
    %96 = memref.load %arg1[%95] : memref<64xi32, #tpu.memory_space<smem>>
    %97 = arith.index_cast %96 : i32 to index
    %c0_42 = arith.constant 0 : index
    %98 = vector.load %arg3[%97, %c0_42] : memref<128x128xf32, #tpu.memory_space<vmem>>, vector<1x128xf32>
    %c8_i32_43 = arith.constant 8 : i32
    %99 = arith.muli %68, %c8_i32_43 : i32
    %c5_i32_44 = arith.constant 5 : i32
    %100 = arith.addi %99, %c5_i32_44 : i32
    %101 = arith.index_cast %100 : i32 to index
    %102 = memref.load %arg1[%101] : memref<64xi32, #tpu.memory_space<smem>>
    %103 = arith.index_cast %102 : i32 to index
    %c0_45 = arith.constant 0 : index
    %104 = vector.load %arg3[%103, %c0_45] : memref<128x128xf32, #tpu.memory_space<vmem>>, vector<1x128xf32>
    %c8_i32_46 = arith.constant 8 : i32
    %105 = arith.muli %68, %c8_i32_46 : i32
    %c6_i32_47 = arith.constant 6 : i32
    %106 = arith.addi %105, %c6_i32_47 : i32
    %107 = arith.index_cast %106 : i32 to index
    %108 = memref.load %arg1[%107] : memref<64xi32, #tpu.memory_space<smem>>
    %109 = arith.index_cast %108 : i32 to index
    %c0_48 = arith.constant 0 : index
    %110 = vector.load %arg3[%109, %c0_48] : memref<128x128xf32, #tpu.memory_space<vmem>>, vector<1x128xf32>
    %c8_i32_49 = arith.constant 8 : i32
    %111 = arith.muli %68, %c8_i32_49 : i32
    %c7_i32_50 = arith.constant 7 : i32
    %112 = arith.addi %111, %c7_i32_50 : i32
    %113 = arith.index_cast %112 : i32 to index
    %114 = memref.load %arg1[%113] : memref<64xi32, #tpu.memory_space<smem>>
    %115 = arith.index_cast %114 : i32 to index
    %c0_51 = arith.constant 0 : index
    %116 = vector.load %arg3[%115, %c0_51] : memref<128x128xf32, #tpu.memory_space<vmem>>, vector<1x128xf32>
    %117 = tpu.concatenate %74, %80, %86, %92, %98, %104, %110, %116 in 0 : vector<1x128xf32>, vector<1x128xf32>, vector<1x128xf32>, vector<1x128xf32>, vector<1x128xf32>, vector<1x128xf32>, vector<1x128xf32>, vector<1x128xf32> -> vector<8x128xf32>
    %c0_52 = arith.constant 0 : index
    %c0_53 = arith.constant 0 : index
    %118 = vector.load %arg4[%c0_52, %c0_53] : memref<128x128xf32, #tpu.memory_space<vmem>>, vector<128x128xf32>
    %cst_54 = arith.constant dense<0.000000e+00> : vector<8x128xf32>
    %119 = tpu.matmul %62, %118, %cst_54 {dimension_numbers = #tpu.dot_dimension_numbers<[1], [0], [0], [1], [0, 0, 1, 1], [], []>} : vector<8x128xf32>, vector<128x128xf32>, vector<8x128xf32> -> vector<8x128xf32>
    %120 = arith.addf %117, %119 : vector<8x128xf32>
    %121 = arith.addf %120, %5 : vector<8x128xf32>
    %122 = math.tanh %121 : vector<8x128xf32>
    %123 = arith.index_cast %c1_i32_26 : i32 to index
    %c0_55 = arith.constant 0 : index
    %c0_56 = arith.constant 0 : index
    %124 = vector.load %arg6[%123, %c0_55, %c0_56] : memref<8x8x128xf32, #tpu.memory_space<vmem>>, vector<1x8x128xf32>
    %125 = vector.shape_cast %124 : vector<1x8x128xf32> to vector<8x128xf32>
    %126 = vector.shape_cast %122 : vector<8x128xf32> to vector<1x8x128xf32>
    tpu.vector_store %arg6[%123, %c0_55, %c0_56], %126 {strides = array<i32>} : memref<8x8x128xf32, #tpu.memory_space<vmem>>, vector<1x8x128xf32>,
    %c2_i32_57 = arith.constant 2 : i32
    %c8_i32_58 = arith.constant 8 : i32
    %127 = arith.muli %arg0, %c8_i32_58 : i32
    %128 = arith.addi %127, %c2_i32_57 : i32
    %c8_i32_59 = arith.constant 8 : i32
    %129 = arith.muli %128, %c8_i32_59 : i32
    %c0_i32_60 = arith.constant 0 : i32
    %130 = arith.addi %129, %c0_i32_60 : i32
    %131 = arith.index_cast %130 : i32 to index
    %132 = memref.load %arg1[%131] : memref<64xi32, #tpu.memory_space<smem>>
    %133 = arith.index_cast %132 : i32 to index
    %c0_61 = arith.constant 0 : index
    %134 = vector.load %arg3[%133, %c0_61] : memref<128x128xf32, #tpu.memory_space<vmem>>, vector<1x128xf32>
    %c8_i32_62 = arith.constant 8 : i32
    %135 = arith.muli %128, %c8_i32_62 : i32
    %c1_i32_63 = arith.constant 1 : i32
    %136 = arith.addi %135, %c1_i32_63 : i32
    %137 = arith.index_cast %136 : i32 to index
    %138 = memref.load %arg1[%137] : memref<64xi32, #tpu.memory_space<smem>>
    %139 = arith.index_cast %138 : i32 to index
    %c0_64 = arith.constant 0 : index
    %140 = vector.load %arg3[%139, %c0_64] : memref<128x128xf32, #tpu.memory_space<vmem>>, vector<1x128xf32>
    %c8_i32_65 = arith.constant 8 : i32
    %141 = arith.muli %128, %c8_i32_65 : i32
    %c2_i32_66 = arith.constant 2 : i32
    %142 = arith.addi %141, %c2_i32_66 : i32
    %143 = arith.index_cast %142 : i32 to index
    %144 = memref.load %arg1[%143] : memref<64xi32, #tpu.memory_space<smem>>
    %145 = arith.index_cast %144 : i32 to index
    %c0_67 = arith.constant 0 : index
    %146 = vector.load %arg3[%145, %c0_67] : memref<128x128xf32, #tpu.memory_space<vmem>>, vector<1x128xf32>
    %c8_i32_68 = arith.constant 8 : i32
    %147 = arith.muli %128, %c8_i32_68 : i32
    %c3_i32_69 = arith.constant 3 : i32
    %148 = arith.addi %147, %c3_i32_69 : i32
    %149 = arith.index_cast %148 : i32 to index
    %150 = memref.load %arg1[%149] : memref<64xi32, #tpu.memory_space<smem>>
    %151 = arith.index_cast %150 : i32 to index
    %c0_70 = arith.constant 0 : index
    %152 = vector.load %arg3[%151, %c0_70] : memref<128x128xf32, #tpu.memory_space<vmem>>, vector<1x128xf32>
    %c8_i32_71 = arith.constant 8 : i32
    %153 = arith.muli %128, %c8_i32_71 : i32
    %c4_i32_72 = arith.constant 4 : i32
    %154 = arith.addi %153, %c4_i32_72 : i32
    %155 = arith.index_cast %154 : i32 to index
    %156 = memref.load %arg1[%155] : memref<64xi32, #tpu.memory_space<smem>>
    %157 = arith.index_cast %156 : i32 to index
    %c0_73 = arith.constant 0 : index
    %158 = vector.load %arg3[%157, %c0_73] : memref<128x128xf32, #tpu.memory_space<vmem>>, vector<1x128xf32>
    %c8_i32_74 = arith.constant 8 : i32
    %159 = arith.muli %128, %c8_i32_74 : i32
    %c5_i32_75 = arith.constant 5 : i32
    %160 = arith.addi %159, %c5_i32_75 : i32
    %161 = arith.index_cast %160 : i32 to index
    %162 = memref.load %arg1[%161] : memref<64xi32, #tpu.memory_space<smem>>
    %163 = arith.index_cast %162 : i32 to index
    %c0_76 = arith.constant 0 : index
    %164 = vector.load %arg3[%163, %c0_76] : memref<128x128xf32, #tpu.memory_space<vmem>>, vector<1x128xf32>
    %c8_i32_77 = arith.constant 8 : i32
    %165 = arith.muli %128, %c8_i32_77 : i32
    %c6_i32_78 = arith.constant 6 : i32
    %166 = arith.addi %165, %c6_i32_78 : i32
    %167 = arith.index_cast %166 : i32 to index
    %168 = memref.load %arg1[%167] : memref<64xi32, #tpu.memory_space<smem>>
    %169 = arith.index_cast %168 : i32 to index
    %c0_79 = arith.constant 0 : index
    %170 = vector.load %arg3[%169, %c0_79] : memref<128x128xf32, #tpu.memory_space<vmem>>, vector<1x128xf32>
    %c8_i32_80 = arith.constant 8 : i32
    %171 = arith.muli %128, %c8_i32_80 : i32
    %c7_i32_81 = arith.constant 7 : i32
    %172 = arith.addi %171, %c7_i32_81 : i32
    %173 = arith.index_cast %172 : i32 to index
    %174 = memref.load %arg1[%173] : memref<64xi32, #tpu.memory_space<smem>>
    %175 = arith.index_cast %174 : i32 to index
    %c0_82 = arith.constant 0 : index
    %176 = vector.load %arg3[%175, %c0_82] : memref<128x128xf32, #tpu.memory_space<vmem>>, vector<1x128xf32>
    %177 = tpu.concatenate %134, %140, %146, %152, %158, %164, %170, %176 in 0 : vector<1x128xf32>, vector<1x128xf32>, vector<1x128xf32>, vector<1x128xf32>, vector<1x128xf32>, vector<1x128xf32>, vector<1x128xf32>, vector<1x128xf32> -> vector<8x128xf32>
    %c0_83 = arith.constant 0 : index
    %c0_84 = arith.constant 0 : index
    %178 = vector.load %arg4[%c0_83, %c0_84] : memref<128x128xf32, #tpu.memory_space<vmem>>, vector<128x128xf32>
    %cst_85 = arith.constant dense<0.000000e+00> : vector<8x128xf32>
    %179 = tpu.matmul %122, %178, %cst_85 {dimension_numbers = #tpu.dot_dimension_numbers<[1], [0], [0], [1], [0, 0, 1, 1], [], []>} : vector<8x128xf32>, vector<128x128xf32>, vector<8x128xf32> -> vector<8x128xf32>
    %180 = arith.addf %177, %179 : vector<8x128xf32>
    %181 = arith.addf %180, %5 : vector<8x128xf32>
    %182 = math.tanh %181 : vector<8x128xf32>
    %183 = arith.index_cast %c2_i32_57 : i32 to index
    %c0_86 = arith.constant 0 : index
    %c0_87 = arith.constant 0 : index
    %184 = vector.load %arg6[%183, %c0_86, %c0_87] : memref<8x8x128xf32, #tpu.memory_space<vmem>>, vector<1x8x128xf32>
    %185 = vector.shape_cast %184 : vector<1x8x128xf32> to vector<8x128xf32>
    %186 = vector.shape_cast %182 : vector<8x128xf32> to vector<1x8x128xf32>
    tpu.vector_store %arg6[%183, %c0_86, %c0_87], %186 {strides = array<i32>} : memref<8x8x128xf32, #tpu.memory_space<vmem>>, vector<1x8x128xf32>,
    %c3_i32_88 = arith.constant 3 : i32
    %c8_i32_89 = arith.constant 8 : i32
    %187 = arith.muli %arg0, %c8_i32_89 : i32
    %188 = arith.addi %187, %c3_i32_88 : i32
    %c8_i32_90 = arith.constant 8 : i32
    %189 = arith.muli %188, %c8_i32_90 : i32
    %c0_i32_91 = arith.constant 0 : i32
    %190 = arith.addi %189, %c0_i32_91 : i32
    %191 = arith.index_cast %190 : i32 to index
    %192 = memref.load %arg1[%191] : memref<64xi32, #tpu.memory_space<smem>>
    %193 = arith.index_cast %192 : i32 to index
    %c0_92 = arith.constant 0 : index
    %194 = vector.load %arg3[%193, %c0_92] : memref<128x128xf32, #tpu.memory_space<vmem>>, vector<1x128xf32>
    %c8_i32_93 = arith.constant 8 : i32
    %195 = arith.muli %188, %c8_i32_93 : i32
    %c1_i32_94 = arith.constant 1 : i32
    %196 = arith.addi %195, %c1_i32_94 : i32
    %197 = arith.index_cast %196 : i32 to index
    %198 = memref.load %arg1[%197] : memref<64xi32, #tpu.memory_space<smem>>
    %199 = arith.index_cast %198 : i32 to index
    %c0_95 = arith.constant 0 : index
    %200 = vector.load %arg3[%199, %c0_95] : memref<128x128xf32, #tpu.memory_space<vmem>>, vector<1x128xf32>
    %c8_i32_96 = arith.constant 8 : i32
    %201 = arith.muli %188, %c8_i32_96 : i32
    %c2_i32_97 = arith.constant 2 : i32
    %202 = arith.addi %201, %c2_i32_97 : i32
    %203 = arith.index_cast %202 : i32 to index
    %204 = memref.load %arg1[%203] : memref<64xi32, #tpu.memory_space<smem>>
    %205 = arith.index_cast %204 : i32 to index
    %c0_98 = arith.constant 0 : index
    %206 = vector.load %arg3[%205, %c0_98] : memref<128x128xf32, #tpu.memory_space<vmem>>, vector<1x128xf32>
    %c8_i32_99 = arith.constant 8 : i32
    %207 = arith.muli %188, %c8_i32_99 : i32
    %c3_i32_100 = arith.constant 3 : i32
    %208 = arith.addi %207, %c3_i32_100 : i32
    %209 = arith.index_cast %208 : i32 to index
    %210 = memref.load %arg1[%209] : memref<64xi32, #tpu.memory_space<smem>>
    %211 = arith.index_cast %210 : i32 to index
    %c0_101 = arith.constant 0 : index
    %212 = vector.load %arg3[%211, %c0_101] : memref<128x128xf32, #tpu.memory_space<vmem>>, vector<1x128xf32>
    %c8_i32_102 = arith.constant 8 : i32
    %213 = arith.muli %188, %c8_i32_102 : i32
    %c4_i32_103 = arith.constant 4 : i32
    %214 = arith.addi %213, %c4_i32_103 : i32
    %215 = arith.index_cast %214 : i32 to index
    %216 = memref.load %arg1[%215] : memref<64xi32, #tpu.memory_space<smem>>
    %217 = arith.index_cast %216 : i32 to index
    %c0_104 = arith.constant 0 : index
    %218 = vector.load %arg3[%217, %c0_104] : memref<128x128xf32, #tpu.memory_space<vmem>>, vector<1x128xf32>
    %c8_i32_105 = arith.constant 8 : i32
    %219 = arith.muli %188, %c8_i32_105 : i32
    %c5_i32_106 = arith.constant 5 : i32
    %220 = arith.addi %219, %c5_i32_106 : i32
    %221 = arith.index_cast %220 : i32 to index
    %222 = memref.load %arg1[%221] : memref<64xi32, #tpu.memory_space<smem>>
    %223 = arith.index_cast %222 : i32 to index
    %c0_107 = arith.constant 0 : index
    %224 = vector.load %arg3[%223, %c0_107] : memref<128x128xf32, #tpu.memory_space<vmem>>, vector<1x128xf32>
    %c8_i32_108 = arith.constant 8 : i32
    %225 = arith.muli %188, %c8_i32_108 : i32
    %c6_i32_109 = arith.constant 6 : i32
    %226 = arith.addi %225, %c6_i32_109 : i32
    %227 = arith.index_cast %226 : i32 to index
    %228 = memref.load %arg1[%227] : memref<64xi32, #tpu.memory_space<smem>>
    %229 = arith.index_cast %228 : i32 to index
    %c0_110 = arith.constant 0 : index
    %230 = vector.load %arg3[%229, %c0_110] : memref<128x128xf32, #tpu.memory_space<vmem>>, vector<1x128xf32>
    %c8_i32_111 = arith.constant 8 : i32
    %231 = arith.muli %188, %c8_i32_111 : i32
    %c7_i32_112 = arith.constant 7 : i32
    %232 = arith.addi %231, %c7_i32_112 : i32
    %233 = arith.index_cast %232 : i32 to index
    %234 = memref.load %arg1[%233] : memref<64xi32, #tpu.memory_space<smem>>
    %235 = arith.index_cast %234 : i32 to index
    %c0_113 = arith.constant 0 : index
    %236 = vector.load %arg3[%235, %c0_113] : memref<128x128xf32, #tpu.memory_space<vmem>>, vector<1x128xf32>
    %237 = tpu.concatenate %194, %200, %206, %212, %218, %224, %230, %236 in 0 : vector<1x128xf32>, vector<1x128xf32>, vector<1x128xf32>, vector<1x128xf32>, vector<1x128xf32>, vector<1x128xf32>, vector<1x128xf32>, vector<1x128xf32> -> vector<8x128xf32>
    %c0_114 = arith.constant 0 : index
    %c0_115 = arith.constant 0 : index
    %238 = vector.load %arg4[%c0_114, %c0_115] : memref<128x128xf32, #tpu.memory_space<vmem>>, vector<128x128xf32>
    %cst_116 = arith.constant dense<0.000000e+00> : vector<8x128xf32>
    %239 = tpu.matmul %182, %238, %cst_116 {dimension_numbers = #tpu.dot_dimension_numbers<[1], [0], [0], [1], [0, 0, 1, 1], [], []>} : vector<8x128xf32>, vector<128x128xf32>, vector<8x128xf32> -> vector<8x128xf32>
    %240 = arith.addf %237, %239 : vector<8x128xf32>
    %241 = arith.addf %240, %5 : vector<8x128xf32>
    %242 = math.tanh %241 : vector<8x128xf32>
    %243 = arith.index_cast %c3_i32_88 : i32 to index
    %c0_117 = arith.constant 0 : index
    %c0_118 = arith.constant 0 : index
    %244 = vector.load %arg6[%243, %c0_117, %c0_118] : memref<8x8x128xf32, #tpu.memory_space<vmem>>, vector<1x8x128xf32>
    %245 = vector.shape_cast %244 : vector<1x8x128xf32> to vector<8x128xf32>
    %246 = vector.shape_cast %242 : vector<8x128xf32> to vector<1x8x128xf32>
    tpu.vector_store %arg6[%243, %c0_117, %c0_118], %246 {strides = array<i32>} : memref<8x8x128xf32, #tpu.memory_space<vmem>>, vector<1x8x128xf32>,
    %c4_i32_119 = arith.constant 4 : i32
    %c8_i32_120 = arith.constant 8 : i32
    %247 = arith.muli %arg0, %c8_i32_120 : i32
    %248 = arith.addi %247, %c4_i32_119 : i32
    %c8_i32_121 = arith.constant 8 : i32
    %249 = arith.muli %248, %c8_i32_121 : i32
    %c0_i32_122 = arith.constant 0 : i32
    %250 = arith.addi %249, %c0_i32_122 : i32
    %251 = arith.index_cast %250 : i32 to index
    %252 = memref.load %arg1[%251] : memref<64xi32, #tpu.memory_space<smem>>
    %253 = arith.index_cast %252 : i32 to index
    %c0_123 = arith.constant 0 : index
    %254 = vector.load %arg3[%253, %c0_123] : memref<128x128xf32, #tpu.memory_space<vmem>>, vector<1x128xf32>
    %c8_i32_124 = arith.constant 8 : i32
    %255 = arith.muli %248, %c8_i32_124 : i32
    %c1_i32_125 = arith.constant 1 : i32
    %256 = arith.addi %255, %c1_i32_125 : i32
    %257 = arith.index_cast %256 : i32 to index
    %258 = memref.load %arg1[%257] : memref<64xi32, #tpu.memory_space<smem>>
    %259 = arith.index_cast %258 : i32 to index
    %c0_126 = arith.constant 0 : index
    %260 = vector.load %arg3[%259, %c0_126] : memref<128x128xf32, #tpu.memory_space<vmem>>, vector<1x128xf32>
    %c8_i32_127 = arith.constant 8 : i32
    %261 = arith.muli %248, %c8_i32_127 : i32
    %c2_i32_128 = arith.constant 2 : i32
    %262 = arith.addi %261, %c2_i32_128 : i32
    %263 = arith.index_cast %262 : i32 to index
    %264 = memref.load %arg1[%263] : memref<64xi32, #tpu.memory_space<smem>>
    %265 = arith.index_cast %264 : i32 to index
    %c0_129 = arith.constant 0 : index
    %266 = vector.load %arg3[%265, %c0_129] : memref<128x128xf32, #tpu.memory_space<vmem>>, vector<1x128xf32>
    %c8_i32_130 = arith.constant 8 : i32
    %267 = arith.muli %248, %c8_i32_130 : i32
    %c3_i32_131 = arith.constant 3 : i32
    %268 = arith.addi %267, %c3_i32_131 : i32
    %269 = arith.index_cast %268 : i32 to index
    %270 = memref.load %arg1[%269] : memref<64xi32, #tpu.memory_space<smem>>
    %271 = arith.index_cast %270 : i32 to index
    %c0_132 = arith.constant 0 : index
    %272 = vector.load %arg3[%271, %c0_132] : memref<128x128xf32, #tpu.memory_space<vmem>>, vector<1x128xf32>
    %c8_i32_133 = arith.constant 8 : i32
    %273 = arith.muli %248, %c8_i32_133 : i32
    %c4_i32_134 = arith.constant 4 : i32
    %274 = arith.addi %273, %c4_i32_134 : i32
    %275 = arith.index_cast %274 : i32 to index
    %276 = memref.load %arg1[%275] : memref<64xi32, #tpu.memory_space<smem>>
    %277 = arith.index_cast %276 : i32 to index
    %c0_135 = arith.constant 0 : index
    %278 = vector.load %arg3[%277, %c0_135] : memref<128x128xf32, #tpu.memory_space<vmem>>, vector<1x128xf32>
    %c8_i32_136 = arith.constant 8 : i32
    %279 = arith.muli %248, %c8_i32_136 : i32
    %c5_i32_137 = arith.constant 5 : i32
    %280 = arith.addi %279, %c5_i32_137 : i32
    %281 = arith.index_cast %280 : i32 to index
    %282 = memref.load %arg1[%281] : memref<64xi32, #tpu.memory_space<smem>>
    %283 = arith.index_cast %282 : i32 to index
    %c0_138 = arith.constant 0 : index
    %284 = vector.load %arg3[%283, %c0_138] : memref<128x128xf32, #tpu.memory_space<vmem>>, vector<1x128xf32>
    %c8_i32_139 = arith.constant 8 : i32
    %285 = arith.muli %248, %c8_i32_139 : i32
    %c6_i32_140 = arith.constant 6 : i32
    %286 = arith.addi %285, %c6_i32_140 : i32
    %287 = arith.index_cast %286 : i32 to index
    %288 = memref.load %arg1[%287] : memref<64xi32, #tpu.memory_space<smem>>
    %289 = arith.index_cast %288 : i32 to index
    %c0_141 = arith.constant 0 : index
    %290 = vector.load %arg3[%289, %c0_141] : memref<128x128xf32, #tpu.memory_space<vmem>>, vector<1x128xf32>
    %c8_i32_142 = arith.constant 8 : i32
    %291 = arith.muli %248, %c8_i32_142 : i32
    %c7_i32_143 = arith.constant 7 : i32
    %292 = arith.addi %291, %c7_i32_143 : i32
    %293 = arith.index_cast %292 : i32 to index
    %294 = memref.load %arg1[%293] : memref<64xi32, #tpu.memory_space<smem>>
    %295 = arith.index_cast %294 : i32 to index
    %c0_144 = arith.constant 0 : index
    %296 = vector.load %arg3[%295, %c0_144] : memref<128x128xf32, #tpu.memory_space<vmem>>, vector<1x128xf32>
    %297 = tpu.concatenate %254, %260, %266, %272, %278, %284, %290, %296 in 0 : vector<1x128xf32>, vector<1x128xf32>, vector<1x128xf32>, vector<1x128xf32>, vector<1x128xf32>, vector<1x128xf32>, vector<1x128xf32>, vector<1x128xf32> -> vector<8x128xf32>
    %c0_145 = arith.constant 0 : index
    %c0_146 = arith.constant 0 : index
    %298 = vector.load %arg4[%c0_145, %c0_146] : memref<128x128xf32, #tpu.memory_space<vmem>>, vector<128x128xf32>
    %cst_147 = arith.constant dense<0.000000e+00> : vector<8x128xf32>
    %299 = tpu.matmul %242, %298, %cst_147 {dimension_numbers = #tpu.dot_dimension_numbers<[1], [0], [0], [1], [0, 0, 1, 1], [], []>} : vector<8x128xf32>, vector<128x128xf32>, vector<8x128xf32> -> vector<8x128xf32>
    %300 = arith.addf %297, %299 : vector<8x128xf32>
    %301 = arith.addf %300, %5 : vector<8x128xf32>
    %302 = math.tanh %301 : vector<8x128xf32>
    %303 = arith.index_cast %c4_i32_119 : i32 to index
    %c0_148 = arith.constant 0 : index
    %c0_149 = arith.constant 0 : index
    %304 = vector.load %arg6[%303, %c0_148, %c0_149] : memref<8x8x128xf32, #tpu.memory_space<vmem>>, vector<1x8x128xf32>
    %305 = vector.shape_cast %304 : vector<1x8x128xf32> to vector<8x128xf32>
    %306 = vector.shape_cast %302 : vector<8x128xf32> to vector<1x8x128xf32>
    tpu.vector_store %arg6[%303, %c0_148, %c0_149], %306 {strides = array<i32>} : memref<8x8x128xf32, #tpu.memory_space<vmem>>, vector<1x8x128xf32>,
    %c5_i32_150 = arith.constant 5 : i32
    %c8_i32_151 = arith.constant 8 : i32
    %307 = arith.muli %arg0, %c8_i32_151 : i32
    %308 = arith.addi %307, %c5_i32_150 : i32
    %c8_i32_152 = arith.constant 8 : i32
    %309 = arith.muli %308, %c8_i32_152 : i32
    %c0_i32_153 = arith.constant 0 : i32
    %310 = arith.addi %309, %c0_i32_153 : i32
    %311 = arith.index_cast %310 : i32 to index
    %312 = memref.load %arg1[%311] : memref<64xi32, #tpu.memory_space<smem>>
    %313 = arith.index_cast %312 : i32 to index
    %c0_154 = arith.constant 0 : index
    %314 = vector.load %arg3[%313, %c0_154] : memref<128x128xf32, #tpu.memory_space<vmem>>, vector<1x128xf32>
    %c8_i32_155 = arith.constant 8 : i32
    %315 = arith.muli %308, %c8_i32_155 : i32
    %c1_i32_156 = arith.constant 1 : i32
    %316 = arith.addi %315, %c1_i32_156 : i32
    %317 = arith.index_cast %316 : i32 to index
    %318 = memref.load %arg1[%317] : memref<64xi32, #tpu.memory_space<smem>>
    %319 = arith.index_cast %318 : i32 to index
    %c0_157 = arith.constant 0 : index
    %320 = vector.load %arg3[%319, %c0_157] : memref<128x128xf32, #tpu.memory_space<vmem>>, vector<1x128xf32>
    %c8_i32_158 = arith.constant 8 : i32
    %321 = arith.muli %308, %c8_i32_158 : i32
    %c2_i32_159 = arith.constant 2 : i32
    %322 = arith.addi %321, %c2_i32_159 : i32
    %323 = arith.index_cast %322 : i32 to index
    %324 = memref.load %arg1[%323] : memref<64xi32, #tpu.memory_space<smem>>
    %325 = arith.index_cast %324 : i32 to index
    %c0_160 = arith.constant 0 : index
    %326 = vector.load %arg3[%325, %c0_160] : memref<128x128xf32, #tpu.memory_space<vmem>>, vector<1x128xf32>
    %c8_i32_161 = arith.constant 8 : i32
    %327 = arith.muli %308, %c8_i32_161 : i32
    %c3_i32_162 = arith.constant 3 : i32
    %328 = arith.addi %327, %c3_i32_162 : i32
    %329 = arith.index_cast %328 : i32 to index
    %330 = memref.load %arg1[%329] : memref<64xi32, #tpu.memory_space<smem>>
    %331 = arith.index_cast %330 : i32 to index
    %c0_163 = arith.constant 0 : index
    %332 = vector.load %arg3[%331, %c0_163] : memref<128x128xf32, #tpu.memory_space<vmem>>, vector<1x128xf32>
    %c8_i32_164 = arith.constant 8 : i32
    %333 = arith.muli %308, %c8_i32_164 : i32
    %c4_i32_165 = arith.constant 4 : i32
    %334 = arith.addi %333, %c4_i32_165 : i32
    %335 = arith.index_cast %334 : i32 to index
    %336 = memref.load %arg1[%335] : memref<64xi32, #tpu.memory_space<smem>>
    %337 = arith.index_cast %336 : i32 to index
    %c0_166 = arith.constant 0 : index
    %338 = vector.load %arg3[%337, %c0_166] : memref<128x128xf32, #tpu.memory_space<vmem>>, vector<1x128xf32>
    %c8_i32_167 = arith.constant 8 : i32
    %339 = arith.muli %308, %c8_i32_167 : i32
    %c5_i32_168 = arith.constant 5 : i32
    %340 = arith.addi %339, %c5_i32_168 : i32
    %341 = arith.index_cast %340 : i32 to index
    %342 = memref.load %arg1[%341] : memref<64xi32, #tpu.memory_space<smem>>
    %343 = arith.index_cast %342 : i32 to index
    %c0_169 = arith.constant 0 : index
    %344 = vector.load %arg3[%343, %c0_169] : memref<128x128xf32, #tpu.memory_space<vmem>>, vector<1x128xf32>
    %c8_i32_170 = arith.constant 8 : i32
    %345 = arith.muli %308, %c8_i32_170 : i32
    %c6_i32_171 = arith.constant 6 : i32
    %346 = arith.addi %345, %c6_i32_171 : i32
    %347 = arith.index_cast %346 : i32 to index
    %348 = memref.load %arg1[%347] : memref<64xi32, #tpu.memory_space<smem>>
    %349 = arith.index_cast %348 : i32 to index
    %c0_172 = arith.constant 0 : index
    %350 = vector.load %arg3[%349, %c0_172] : memref<128x128xf32, #tpu.memory_space<vmem>>, vector<1x128xf32>
    %c8_i32_173 = arith.constant 8 : i32
    %351 = arith.muli %308, %c8_i32_173 : i32
    %c7_i32_174 = arith.constant 7 : i32
    %352 = arith.addi %351, %c7_i32_174 : i32
    %353 = arith.index_cast %352 : i32 to index
    %354 = memref.load %arg1[%353] : memref<64xi32, #tpu.memory_space<smem>>
    %355 = arith.index_cast %354 : i32 to index
    %c0_175 = arith.constant 0 : index
    %356 = vector.load %arg3[%355, %c0_175] : memref<128x128xf32, #tpu.memory_space<vmem>>, vector<1x128xf32>
    %357 = tpu.concatenate %314, %320, %326, %332, %338, %344, %350, %356 in 0 : vector<1x128xf32>, vector<1x128xf32>, vector<1x128xf32>, vector<1x128xf32>, vector<1x128xf32>, vector<1x128xf32>, vector<1x128xf32>, vector<1x128xf32> -> vector<8x128xf32>
    %c0_176 = arith.constant 0 : index
    %c0_177 = arith.constant 0 : index
    %358 = vector.load %arg4[%c0_176, %c0_177] : memref<128x128xf32, #tpu.memory_space<vmem>>, vector<128x128xf32>
    %cst_178 = arith.constant dense<0.000000e+00> : vector<8x128xf32>
    %359 = tpu.matmul %302, %358, %cst_178 {dimension_numbers = #tpu.dot_dimension_numbers<[1], [0], [0], [1], [0, 0, 1, 1], [], []>} : vector<8x128xf32>, vector<128x128xf32>, vector<8x128xf32> -> vector<8x128xf32>
    %360 = arith.addf %357, %359 : vector<8x128xf32>
    %361 = arith.addf %360, %5 : vector<8x128xf32>
    %362 = math.tanh %361 : vector<8x128xf32>
    %363 = arith.index_cast %c5_i32_150 : i32 to index
    %c0_179 = arith.constant 0 : index
    %c0_180 = arith.constant 0 : index
    %364 = vector.load %arg6[%363, %c0_179, %c0_180] : memref<8x8x128xf32, #tpu.memory_space<vmem>>, vector<1x8x128xf32>
    %365 = vector.shape_cast %364 : vector<1x8x128xf32> to vector<8x128xf32>
    %366 = vector.shape_cast %362 : vector<8x128xf32> to vector<1x8x128xf32>
    tpu.vector_store %arg6[%363, %c0_179, %c0_180], %366 {strides = array<i32>} : memref<8x8x128xf32, #tpu.memory_space<vmem>>, vector<1x8x128xf32>,
    %c6_i32_181 = arith.constant 6 : i32
    %c8_i32_182 = arith.constant 8 : i32
    %367 = arith.muli %arg0, %c8_i32_182 : i32
    %368 = arith.addi %367, %c6_i32_181 : i32
    %c8_i32_183 = arith.constant 8 : i32
    %369 = arith.muli %368, %c8_i32_183 : i32
    %c0_i32_184 = arith.constant 0 : i32
    %370 = arith.addi %369, %c0_i32_184 : i32
    %371 = arith.index_cast %370 : i32 to index
    %372 = memref.load %arg1[%371] : memref<64xi32, #tpu.memory_space<smem>>
    %373 = arith.index_cast %372 : i32 to index
    %c0_185 = arith.constant 0 : index
    %374 = vector.load %arg3[%373, %c0_185] : memref<128x128xf32, #tpu.memory_space<vmem>>, vector<1x128xf32>
    %c8_i32_186 = arith.constant 8 : i32
    %375 = arith.muli %368, %c8_i32_186 : i32
    %c1_i32_187 = arith.constant 1 : i32
    %376 = arith.addi %375, %c1_i32_187 : i32
    %377 = arith.index_cast %376 : i32 to index
    %378 = memref.load %arg1[%377] : memref<64xi32, #tpu.memory_space<smem>>
    %379 = arith.index_cast %378 : i32 to index
    %c0_188 = arith.constant 0 : index
    %380 = vector.load %arg3[%379, %c0_188] : memref<128x128xf32, #tpu.memory_space<vmem>>, vector<1x128xf32>
    %c8_i32_189 = arith.constant 8 : i32
    %381 = arith.muli %368, %c8_i32_189 : i32
    %c2_i32_190 = arith.constant 2 : i32
    %382 = arith.addi %381, %c2_i32_190 : i32
    %383 = arith.index_cast %382 : i32 to index
    %384 = memref.load %arg1[%383] : memref<64xi32, #tpu.memory_space<smem>>
    %385 = arith.index_cast %384 : i32 to index
    %c0_191 = arith.constant 0 : index
    %386 = vector.load %arg3[%385, %c0_191] : memref<128x128xf32, #tpu.memory_space<vmem>>, vector<1x128xf32>
    %c8_i32_192 = arith.constant 8 : i32
    %387 = arith.muli %368, %c8_i32_192 : i32
    %c3_i32_193 = arith.constant 3 : i32
    %388 = arith.addi %387, %c3_i32_193 : i32
    %389 = arith.index_cast %388 : i32 to index
    %390 = memref.load %arg1[%389] : memref<64xi32, #tpu.memory_space<smem>>
    %391 = arith.index_cast %390 : i32 to index
    %c0_194 = arith.constant 0 : index
    %392 = vector.load %arg3[%391, %c0_194] : memref<128x128xf32, #tpu.memory_space<vmem>>, vector<1x128xf32>
    %c8_i32_195 = arith.constant 8 : i32
    %393 = arith.muli %368, %c8_i32_195 : i32
    %c4_i32_196 = arith.constant 4 : i32
    %394 = arith.addi %393, %c4_i32_196 : i32
    %395 = arith.index_cast %394 : i32 to index
    %396 = memref.load %arg1[%395] : memref<64xi32, #tpu.memory_space<smem>>
    %397 = arith.index_cast %396 : i32 to index
    %c0_197 = arith.constant 0 : index
    %398 = vector.load %arg3[%397, %c0_197] : memref<128x128xf32, #tpu.memory_space<vmem>>, vector<1x128xf32>
    %c8_i32_198 = arith.constant 8 : i32
    %399 = arith.muli %368, %c8_i32_198 : i32
    %c5_i32_199 = arith.constant 5 : i32
    %400 = arith.addi %399, %c5_i32_199 : i32
    %401 = arith.index_cast %400 : i32 to index
    %402 = memref.load %arg1[%401] : memref<64xi32, #tpu.memory_space<smem>>
    %403 = arith.index_cast %402 : i32 to index
    %c0_200 = arith.constant 0 : index
    %404 = vector.load %arg3[%403, %c0_200] : memref<128x128xf32, #tpu.memory_space<vmem>>, vector<1x128xf32>
    %c8_i32_201 = arith.constant 8 : i32
    %405 = arith.muli %368, %c8_i32_201 : i32
    %c6_i32_202 = arith.constant 6 : i32
    %406 = arith.addi %405, %c6_i32_202 : i32
    %407 = arith.index_cast %406 : i32 to index
    %408 = memref.load %arg1[%407] : memref<64xi32, #tpu.memory_space<smem>>
    %409 = arith.index_cast %408 : i32 to index
    %c0_203 = arith.constant 0 : index
    %410 = vector.load %arg3[%409, %c0_203] : memref<128x128xf32, #tpu.memory_space<vmem>>, vector<1x128xf32>
    %c8_i32_204 = arith.constant 8 : i32
    %411 = arith.muli %368, %c8_i32_204 : i32
    %c7_i32_205 = arith.constant 7 : i32
    %412 = arith.addi %411, %c7_i32_205 : i32
    %413 = arith.index_cast %412 : i32 to index
    %414 = memref.load %arg1[%413] : memref<64xi32, #tpu.memory_space<smem>>
    %415 = arith.index_cast %414 : i32 to index
    %c0_206 = arith.constant 0 : index
    %416 = vector.load %arg3[%415, %c0_206] : memref<128x128xf32, #tpu.memory_space<vmem>>, vector<1x128xf32>
    %417 = tpu.concatenate %374, %380, %386, %392, %398, %404, %410, %416 in 0 : vector<1x128xf32>, vector<1x128xf32>, vector<1x128xf32>, vector<1x128xf32>, vector<1x128xf32>, vector<1x128xf32>, vector<1x128xf32>, vector<1x128xf32> -> vector<8x128xf32>
    %c0_207 = arith.constant 0 : index
    %c0_208 = arith.constant 0 : index
    %418 = vector.load %arg4[%c0_207, %c0_208] : memref<128x128xf32, #tpu.memory_space<vmem>>, vector<128x128xf32>
    %cst_209 = arith.constant dense<0.000000e+00> : vector<8x128xf32>
    %419 = tpu.matmul %362, %418, %cst_209 {dimension_numbers = #tpu.dot_dimension_numbers<[1], [0], [0], [1], [0, 0, 1, 1], [], []>} : vector<8x128xf32>, vector<128x128xf32>, vector<8x128xf32> -> vector<8x128xf32>
    %420 = arith.addf %417, %419 : vector<8x128xf32>
    %421 = arith.addf %420, %5 : vector<8x128xf32>
    %422 = math.tanh %421 : vector<8x128xf32>
    %423 = arith.index_cast %c6_i32_181 : i32 to index
    %c0_210 = arith.constant 0 : index
    %c0_211 = arith.constant 0 : index
    %424 = vector.load %arg6[%423, %c0_210, %c0_211] : memref<8x8x128xf32, #tpu.memory_space<vmem>>, vector<1x8x128xf32>
    %425 = vector.shape_cast %424 : vector<1x8x128xf32> to vector<8x128xf32>
    %426 = vector.shape_cast %422 : vector<8x128xf32> to vector<1x8x128xf32>
    tpu.vector_store %arg6[%423, %c0_210, %c0_211], %426 {strides = array<i32>} : memref<8x8x128xf32, #tpu.memory_space<vmem>>, vector<1x8x128xf32>,
    %c7_i32_212 = arith.constant 7 : i32
    %c8_i32_213 = arith.constant 8 : i32
    %427 = arith.muli %arg0, %c8_i32_213 : i32
    %428 = arith.addi %427, %c7_i32_212 : i32
    %c8_i32_214 = arith.constant 8 : i32
    %429 = arith.muli %428, %c8_i32_214 : i32
    %c0_i32_215 = arith.constant 0 : i32
    %430 = arith.addi %429, %c0_i32_215 : i32
    %431 = arith.index_cast %430 : i32 to index
    %432 = memref.load %arg1[%431] : memref<64xi32, #tpu.memory_space<smem>>
    %433 = arith.index_cast %432 : i32 to index
    %c0_216 = arith.constant 0 : index
    %434 = vector.load %arg3[%433, %c0_216] : memref<128x128xf32, #tpu.memory_space<vmem>>, vector<1x128xf32>
    %c8_i32_217 = arith.constant 8 : i32
    %435 = arith.muli %428, %c8_i32_217 : i32
    %c1_i32_218 = arith.constant 1 : i32
    %436 = arith.addi %435, %c1_i32_218 : i32
    %437 = arith.index_cast %436 : i32 to index
    %438 = memref.load %arg1[%437] : memref<64xi32, #tpu.memory_space<smem>>
    %439 = arith.index_cast %438 : i32 to index
    %c0_219 = arith.constant 0 : index
    %440 = vector.load %arg3[%439, %c0_219] : memref<128x128xf32, #tpu.memory_space<vmem>>, vector<1x128xf32>
    %c8_i32_220 = arith.constant 8 : i32
    %441 = arith.muli %428, %c8_i32_220 : i32
    %c2_i32_221 = arith.constant 2 : i32
    %442 = arith.addi %441, %c2_i32_221 : i32
    %443 = arith.index_cast %442 : i32 to index
    %444 = memref.load %arg1[%443] : memref<64xi32, #tpu.memory_space<smem>>
    %445 = arith.index_cast %444 : i32 to index
    %c0_222 = arith.constant 0 : index
    %446 = vector.load %arg3[%445, %c0_222] : memref<128x128xf32, #tpu.memory_space<vmem>>, vector<1x128xf32>
    %c8_i32_223 = arith.constant 8 : i32
    %447 = arith.muli %428, %c8_i32_223 : i32
    %c3_i32_224 = arith.constant 3 : i32
    %448 = arith.addi %447, %c3_i32_224 : i32
    %449 = arith.index_cast %448 : i32 to index
    %450 = memref.load %arg1[%449] : memref<64xi32, #tpu.memory_space<smem>>
    %451 = arith.index_cast %450 : i32 to index
    %c0_225 = arith.constant 0 : index
    %452 = vector.load %arg3[%451, %c0_225] : memref<128x128xf32, #tpu.memory_space<vmem>>, vector<1x128xf32>
    %c8_i32_226 = arith.constant 8 : i32
    %453 = arith.muli %428, %c8_i32_226 : i32
    %c4_i32_227 = arith.constant 4 : i32
    %454 = arith.addi %453, %c4_i32_227 : i32
    %455 = arith.index_cast %454 : i32 to index
    %456 = memref.load %arg1[%455] : memref<64xi32, #tpu.memory_space<smem>>
    %457 = arith.index_cast %456 : i32 to index
    %c0_228 = arith.constant 0 : index
    %458 = vector.load %arg3[%457, %c0_228] : memref<128x128xf32, #tpu.memory_space<vmem>>, vector<1x128xf32>
    %c8_i32_229 = arith.constant 8 : i32
    %459 = arith.muli %428, %c8_i32_229 : i32
    %c5_i32_230 = arith.constant 5 : i32
    %460 = arith.addi %459, %c5_i32_230 : i32
    %461 = arith.index_cast %460 : i32 to index
    %462 = memref.load %arg1[%461] : memref<64xi32, #tpu.memory_space<smem>>
    %463 = arith.index_cast %462 : i32 to index
    %c0_231 = arith.constant 0 : index
    %464 = vector.load %arg3[%463, %c0_231] : memref<128x128xf32, #tpu.memory_space<vmem>>, vector<1x128xf32>
    %c8_i32_232 = arith.constant 8 : i32
    %465 = arith.muli %428, %c8_i32_232 : i32
    %c6_i32_233 = arith.constant 6 : i32
    %466 = arith.addi %465, %c6_i32_233 : i32
    %467 = arith.index_cast %466 : i32 to index
    %468 = memref.load %arg1[%467] : memref<64xi32, #tpu.memory_space<smem>>
    %469 = arith.index_cast %468 : i32 to index
    %c0_234 = arith.constant 0 : index
    %470 = vector.load %arg3[%469, %c0_234] : memref<128x128xf32, #tpu.memory_space<vmem>>, vector<1x128xf32>
    %c8_i32_235 = arith.constant 8 : i32
    %471 = arith.muli %428, %c8_i32_235 : i32
    %c7_i32_236 = arith.constant 7 : i32
    %472 = arith.addi %471, %c7_i32_236 : i32
    %473 = arith.index_cast %472 : i32 to index
    %474 = memref.load %arg1[%473] : memref<64xi32, #tpu.memory_space<smem>>
    %475 = arith.index_cast %474 : i32 to index
    %c0_237 = arith.constant 0 : index
    %476 = vector.load %arg3[%475, %c0_237] : memref<128x128xf32, #tpu.memory_space<vmem>>, vector<1x128xf32>
    %477 = tpu.concatenate %434, %440, %446, %452, %458, %464, %470, %476 in 0 : vector<1x128xf32>, vector<1x128xf32>, vector<1x128xf32>, vector<1x128xf32>, vector<1x128xf32>, vector<1x128xf32>, vector<1x128xf32>, vector<1x128xf32> -> vector<8x128xf32>
    %c0_238 = arith.constant 0 : index
    %c0_239 = arith.constant 0 : index
    %478 = vector.load %arg4[%c0_238, %c0_239] : memref<128x128xf32, #tpu.memory_space<vmem>>, vector<128x128xf32>
    %cst_240 = arith.constant dense<0.000000e+00> : vector<8x128xf32>
    %479 = tpu.matmul %422, %478, %cst_240 {dimension_numbers = #tpu.dot_dimension_numbers<[1], [0], [0], [1], [0, 0, 1, 1], [], []>} : vector<8x128xf32>, vector<128x128xf32>, vector<8x128xf32> -> vector<8x128xf32>
    %480 = arith.addf %477, %479 : vector<8x128xf32>
    %481 = arith.addf %480, %5 : vector<8x128xf32>
    %482 = math.tanh %481 : vector<8x128xf32>
    %483 = arith.index_cast %c7_i32_212 : i32 to index
    %c0_241 = arith.constant 0 : index
    %c0_242 = arith.constant 0 : index
    %484 = vector.load %arg6[%483, %c0_241, %c0_242] : memref<8x8x128xf32, #tpu.memory_space<vmem>>, vector<1x8x128xf32>
    %485 = vector.shape_cast %484 : vector<1x8x128xf32> to vector<8x128xf32>
    %486 = vector.shape_cast %482 : vector<8x128xf32> to vector<1x8x128xf32>
    tpu.vector_store %arg6[%483, %c0_241, %c0_242], %486 {strides = array<i32>} : memref<8x8x128xf32, #tpu.memory_space<vmem>>, vector<1x8x128xf32>,
    %c8_i32_243 = arith.constant 8 : i32
    %c0_244 = arith.constant 0 : index
    %c0_245 = arith.constant 0 : index
    %487 = vector.load %arg8[%c0_244, %c0_245] : memref<8x128xf32, #tpu.memory_space<vmem>>, vector<8x128xf32>
    tpu.vector_store %arg8[%c0_244, %c0_245], %482 {strides = array<i32>} : memref<8x128xf32, #tpu.memory_space<vmem>>, vector<8x128xf32>,
    %c0_i32_246 = arith.constant 0 : i32
    %488 = arith.cmpi eq, %arg0, %c0_i32_246 : i32
    %489 = arith.extui %488 : i1 to i32
    %c0_i32_247 = arith.constant 0 : i32
    %490 = arith.cmpi ne, %489, %c0_i32_247 : i32
    scf.if %490 {
      %c0_248 = arith.constant 0 : index
      %c0_249 = arith.constant 0 : index
      %491 = vector.load %arg7[%c0_248, %c0_249] : memref<8x128xf32, #tpu.memory_space<vmem>>, vector<8x128xf32>
      tpu.vector_store %arg7[%c0_248, %c0_249], %482 {strides = array<i32>} : memref<8x128xf32, #tpu.memory_space<vmem>>, vector<8x128xf32>,
    } else {
    }
    return
  }
  func.func @transform_0(%arg0: i32, %arg1: memref<64xi32, #tpu.memory_space<smem>>) -> (i32, i32) {
    %c0_i32 = arith.constant 0 : i32
    %c0_i32_0 = arith.constant 0 : i32
    %c0_i32_1 = arith.constant 0 : i32
    return %c0_i32, %c0_i32_0 : i32, i32
  }
  func.func @transform_1(%arg0: i32, %arg1: memref<64xi32, #tpu.memory_space<smem>>) -> (i32, i32) {
    %c0_i32 = arith.constant 0 : i32
    %c0_i32_0 = arith.constant 0 : i32
    %c0_i32_1 = arith.constant 0 : i32
    return %c0_i32, %c0_i32_0 : i32, i32
  }
  func.func @transform_2(%arg0: i32, %arg1: memref<64xi32, #tpu.memory_space<smem>>) -> (i32, i32) {
    %c0_i32 = arith.constant 0 : i32
    %c0_i32_0 = arith.constant 0 : i32
    %c0_i32_1 = arith.constant 0 : i32
    return %c0_i32, %c0_i32_0 : i32, i32
  }
  func.func @transform_3(%arg0: i32, %arg1: memref<64xi32, #tpu.memory_space<smem>>) -> (i32, i32) {
    %c0_i32 = arith.constant 0 : i32
    %c0_i32_0 = arith.constant 0 : i32
    %c0_i32_1 = arith.constant 0 : i32
    return %c0_i32, %c0_i32_0 : i32, i32
  }
  func.func @transform_4(%arg0: i32, %arg1: memref<64xi32, #tpu.memory_space<smem>>) -> (i32, i32, i32) {
    %c0_i32 = arith.constant 0 : i32
    %c0_i32_0 = arith.constant 0 : i32
    %c0_i32_1 = arith.constant 0 : i32
    return %arg0, %c0_i32, %c0_i32_0 : i32, i32, i32
  }
  func.func @transform_5(%arg0: i32, %arg1: memref<64xi32, #tpu.memory_space<smem>>) -> (i32, i32) {
    %c0_i32 = arith.constant 0 : i32
    %c0_i32_0 = arith.constant 0 : i32
    %c0_i32_1 = arith.constant 0 : i32
    return %c0_i32, %c0_i32_0 : i32, i32
  }
}

</mosaic_0001>

<bundles_post_ra>
// kernel: tpu_custom_call.1
= control target key start
LH: loop header
LB: loop body
LE: loop exit
PB: predicated region body
PF: predicated region fallthrough
CT: control target
= control target key end

     0   :  { %s1243_s24 = smov [#allocation4]   ;;  %s1536_s0 = inlined_call_operand.hbm [shape: s32[64], index: 0, kind: input, shape index: {}]   ;;  %s1537_s1 = inlined_call_operand.hbm [shape: f32[8,128], index: 1, kind: input, shape index: {}]   ;;  %s1538_s2 = inlined_call_operand.hbm [shape: f32[128,128], index: 2, kind: input, shape index: {}]   ;;  %s1539_s3 = inlined_call_operand.hbm [shape: f32[128,128], index: 3, kind: input, shape index: {}]   ;;  %s1540_s4 = inlined_call_operand.vmem [shape: f32[1,128], index: 4, kind: input, shape index: {}]   ;;  %s1541_s5 = inlined_call_operand.hbm [shape: f32[8,8,128], index: 5, kind: output, shape index: {0}]   ;;  %s1542_s6 = inlined_call_operand.hbm [shape: f32[8,128], index: 6, kind: output, shape index: {1}]  }
   0x1   :  { %s13_s23 = sshll.u32 %s1536_s0, 4  ;;  %s14_s23 = int_to_ptr.hbm [resolvable:$true] %s13_s23 }
   0x2   :  { %16 = dma.hbm_to_smem %s14_s23, 16, %s1243_s24, [#allocation3] }
   0x3   :  { %1233 = dma.done.wait [#allocation3], 16 }
   0x4   :  { %1234 = vsyncadd [#allocation3], 4294967280 }
   0x5   :  { %19 = sfence }
   0x6   :  { %20 = vsyncpa [#allocation6], 0 }
   0x7   :  { %21 = vsyncpa [#allocation9], 0 }
   0x8   :  { %22 = vsyncpa [#allocation7], 0  ;;  %s39_s27 = sshll.u32 %s1538_s2, 4  ;;  %s40_s27 = int_to_ptr.hbm [resolvable:$true] %s39_s27 }
   0x9   :  { %23 = vsyncpa [#allocation13], 0  ;;  %s1244_s28 = smov [#allocation8]   ;;  %s29_s7 = sshll.u32 %s1537_s1, 4  ;;  %s30_s7 = int_to_ptr.hbm [resolvable:$true] %s29_s7 }
   0xa   :  { %s41_s29 = sshll.u32 %s1244_s28, 4  ;;  %s1245_s8 = smov 128   ;;  %s42_s29 = int_to_ptr.vmem [resolvable:$true] %s41_s29 }
   0xb   :  { %s1246_s9 = smov 8   ;;  %s1247_s10 = smov [#allocation5]  }
   0xc   :  { %47 = dma.hbm_to_vmem [thread:$0]  %s40_s27, 2048, %s42_s29, [#allocation9], %s1245_s8, %s1245_s8, %s1246_s9  }
   0xd   :  { %s31_s11 = sshll.u32 %s1247_s10, 4  ;;  %s52_s13 = sshll.u32 %s1539_s3, 4  ;;  %s32_s11 = int_to_ptr.vmem [resolvable:$true] %s31_s11  ;;  %s53_s13 = int_to_ptr.hbm [resolvable:$true] %s52_s13 }
   0xe   :  { %34 = dma.hbm_to_vmem [thread:$0]  %s30_s7, 128, %s32_s11, [#allocation6]  }
   0xf   :  { %s1248_s14 = smov [#allocation10]  }
  0x10   :  { %s54_s15 = sshll.u32 %s1248_s14, 4  ;;  %s55_s15 = int_to_ptr.vmem [resolvable:$true] %s54_s15 }
  0x11   :  { %60 = dma.hbm_to_vmem [thread:$0]  %s53_s13, 2048, %s55_s15, [#allocation9], %s1245_s8, %s1245_s8, %s1246_s9  }
  0x12   :  { %1235 = dma.done.wait [#allocation6], 128  }
  0x13   :  { %1236 = vsyncadd [#allocation6], 4294967168 }
  0x14   :  { %1237 = dma.done.wait [#allocation9], 4096  }
  0x15   :  { %1238 = vsyncadd [#allocation9], 4294963200  ;;  %v1304_v0 = vld [vmem:[#allocation10 + $0x78] sm:$0xff]  ;;  %v1306_v1 = vld [vmem:[#allocation10 + $0x70] sm:$0xff]  ;;  %s1013_s1 = sld [smem:[#allocation4 + $0x1]]  ;;  %vm139_vm0 = vcmask 1040384  }
  0x16   :  { %169 = vmatpush.msra.mxu0 %v1304_v0  ;;  %271 = vmatpush.msra.mxu1 %v1304_v0  ;;  %v1310_v2 = vld [vmem:[#allocation10 + $0x68] sm:$0xff]  ;;  %v1316_v3 = vld [vmem:[#allocation10 + $0x60] sm:$0xff]  ;;  %v1322_v4 = vld [vmem:[#allocation10 + $0x58] sm:$0xff]  ;;  %s1014_s3 = sld [smem:[#allocation4 + $0x2]]  ;;  %vm141_vm1 = vcmask 1041408   ;;  %vm143_vm2 = vcmask 1042432  }
  0x17   :  { %373 = vmatpush.msra.mxu2 %v1304_v0  ;;  %475 = vmatpush.msra.mxu3 %v1304_v0  ;;  %v1328_v5 = vld [vmem:[#allocation10 + $0x50] sm:$0xff]  ;;  %v1334_v6 = vld [vmem:[#allocation10 + $0x48] sm:$0xff]  ;;  %v1340_v7 = vld [vmem:[#allocation10 + $0x40] sm:$0xff]  ;;  %s87_s16 = sld [smem:[#allocation4]]  ;;  %vm145_vm3 = vcmask 1043456   ;;  %vm147_vm4 = vcmask 1044480  }
  0x18   :  { %170 = vmatpush.msra.mxu0 %v1306_v1  ;;  %272 = vmatpush.msra.mxu1 %v1306_v1  ;;  %v1346_v8 = vld [vmem:[#allocation10 + $0x38] sm:$0xff]  ;;  %v1352_v9 = vld [vmem:[#allocation10 + $0x30] sm:$0xff]  ;;  %v1358_v10 = vld [vmem:[#allocation10 + $0x28] sm:$0xff]  ;;  %s1015_s17 = sld [smem:[#allocation4 + $0x3]]  ;;  %vm149_vm5 = vcmask 1045504   ;;  %vm151_vm6 = vcmask 1046528  }
  0x19   :  { %374 = vmatpush.msra.mxu2 %v1306_v1  ;;  %476 = vmatpush.msra.mxu3 %v1306_v1  ;;  %v1364_v11 = vld [vmem:[#allocation10 + $0x20] sm:$0xff]  ;;  %v1370_v12 = vld [vmem:[#allocation10 + $0x18] sm:$0xff]  ;;  %v1376_v13 = vld [vmem:[#allocation10 + $0x10] sm:$0xff]  ;;  %s1016_s18 = sld [smem:[#allocation4 + $0x4]] }
  0x1a   :  { %171 = vmatpush.msra.mxu0 %v1310_v2  ;;  %273 = vmatpush.msra.mxu1 %v1310_v2  ;;  %v1382_v14 = vld [vmem:[#allocation10 + $0x8] sm:$0xff]  ;;  %v1388_v15 = vld [vmem:[#allocation10] sm:$0xff]  ;;  %v79_v16 = vld [vmem:[#allocation5] sm:$0xff]  ;;  %s1017_s20 = sld [smem:[#allocation4 + $0x5]] }
  0x1b   :  { %375 = vmatpush.msra.mxu2 %v1310_v2  ;;  %477 = vmatpush.msra.mxu3 %v1310_v2  ;;  %s92_s19 = scalar_lea.vmem [#allocation8], %s1013_s1  ;;  %s1018_s23 = sld [smem:[#allocation4 + $0x6]]  ;;  %v1468_v39 = vld [vmem:[%s1540_s4] ss:$0 sm:$0xff] }
  0x1c   :  { %172 = vmatpush.msra.mxu0 %v1316_v3  ;;  %274 = vmatpush.msra.mxu1 %v1316_v3  ;;  %v93_v17 = vld [vmem:[%s92_s19] sm:$0x1]  ;;  %s96_s21 = scalar_lea.vmem [#allocation8], %s1014_s3  ;;  %s1019_s25 = sld [smem:[#allocation4 + $0x7]] }
  0x1d   :  { %376 = vmatpush.msra.mxu2 %v1316_v3  ;;  %478 = vmatpush.msra.mxu3 %v1316_v3  ;;  %v97_v18 = vld [vmem:[%s96_s21] sm:$0x1]  ;;  %v119_v19 = vrot.slane %v93_v17, 7  ;;  %s88_s22 = scalar_lea.vmem [#allocation8], %s87_s16  ;;  %s1021_s7 = sld [smem:[#allocation4 + $0x9]] }
  0x1e   :  { %173 = vmatpush.msra.mxu0 %v1322_v4  ;;  %275 = vmatpush.msra.mxu1 %v1322_v4  ;;  %v89_v20 = vld [vmem:[%s88_s22] sm:$0x1]  ;;  %s100_s24 = scalar_lea.vmem [#allocation8], %s1015_s17  ;;  %v122_v22 = vrot.slane %v97_v18, 6  ;;  %s1022_s10 = sld [smem:[#allocation4 + $0xa]] }
  0x1f   :  { %377 = vmatpush.msra.mxu2 %v1322_v4  ;;  %479 = vmatpush.msra.mxu3 %v1322_v4  ;;  %v101_v21 = vld [vmem:[%s100_s24] sm:$0x1]  ;;  %v140_v23 = vsel %vm139_vm0, %v89_v20, %v119_v19  ;;  %s104_s26 = scalar_lea.vmem [#allocation8], %s1016_s18  ;;  %s1020_s11 = sld [smem:[#allocation4 + $0x8]] }
  0x20   :  { %174 = vmatpush.msra.mxu0 %v1328_v5  ;;  %276 = vmatpush.msra.mxu1 %v1328_v5  ;;  %v105_v24 = vld [vmem:[%s104_s26] sm:$0x1]  ;;  %v125_v25 = vrot.slane %v101_v21, 5  ;;  %v142_v26 = vsel %vm141_vm1, %v140_v23, %v122_v22  ;;  %s108_s27 = scalar_lea.vmem [#allocation8], %s1017_s20  ;;  %s1023_s12 = sld [smem:[#allocation4 + $0xb]] }
  0x21   :  { %378 = vmatpush.msra.mxu2 %v1328_v5  ;;  %480 = vmatpush.msra.mxu3 %v1328_v5  ;;  %v109_v27 = vld [vmem:[%s108_s27] sm:$0x1]  ;;  %v128_v28 = vrot.slane %v105_v24, 4  ;;  %s112_s28 = scalar_lea.vmem [#allocation8], %s1018_s23  ;;  %s1024_s2 = sld [smem:[#allocation4 + $0xc]] }
  0x22   :  { %175 = vmatpush.msra.mxu0 %v1334_v6  ;;  %277 = vmatpush.msra.mxu1 %v1334_v6  ;;  %v144_v29 = vsel %vm143_vm2, %v142_v26, %v125_v25  ;;  %v113_v30 = vld [vmem:[%s112_s28] sm:$0x1]  ;;  %v131_v31 = vrot.slane %v109_v27, 3  ;;  %s116_s29 = scalar_lea.vmem [#allocation8], %s1019_s25  ;;  %s1025_s14 = sld [smem:[#allocation4 + $0xd]] }
  0x23   :  { %379 = vmatpush.msra.mxu2 %v1334_v6  ;;  %481 = vmatpush.msra.mxu3 %v1334_v6  ;;  %v146_v32 = vsel %vm145_vm3, %v144_v29, %v128_v28  ;;  %v117_v33 = vld [vmem:[%s116_s29] sm:$0x1]  ;;  %v134_v34 = vrot.slane %v113_v30, 2  ;;  %s201_s13 = scalar_lea.vmem [#allocation8], %s1021_s7  ;;  %s1026_s1 = sld [smem:[#allocation4 + $0xe]] }
  0x24   :  { %176 = vmatpush.msra.mxu0 %v1340_v7  ;;  %278 = vmatpush.msra.mxu1 %v1340_v7  ;;  %v148_v35 = vsel %vm147_vm4, %v146_v32, %v131_v31  ;;  %v137_v36 = vrot.slane %v117_v33, 1  ;;  %v202_v44 = vld [vmem:[%s201_s13] sm:$0x1]  ;;  %s205_s15 = scalar_lea.vmem [#allocation8], %s1022_s10  ;;  %s1027_s16 = sld [smem:[#allocation4 + $0xf]] }
  0x25   :  { %380 = vmatpush.msra.mxu2 %v1340_v7  ;;  %482 = vmatpush.msra.mxu3 %v1340_v7  ;;  %v150_v37 = vsel %vm149_vm5, %v148_v35, %v134_v34  ;;  %v206_v45 = vld [vmem:[%s205_s15] sm:$0x1]  ;;  %v228_v46 = vrot.slane %v202_v44, 7  ;;  %s197_s4 = scalar_lea.vmem [#allocation8], %s1020_s11  ;;  %s1029_s21 = sld [smem:[#allocation4 + $0x11]] }
  0x26   :  { %177 = vmatpush.msra.mxu0 %v1346_v8  ;;  %279 = vmatpush.msra.mxu1 %v1346_v8  ;;  %v152_v38 = vsel %vm151_vm6, %v150_v37, %v137_v36  ;;  %v198_v47 = vld [vmem:[%s197_s4] sm:$0x1]  ;;  %s209_s3 = scalar_lea.vmem [#allocation8], %s1023_s12  ;;  %v231_v49 = vrot.slane %v206_v45, 6  ;;  %s1030_s22 = sld [smem:[#allocation4 + $0x12]] }
  0x27   :  { %381 = vmatpush.msra.mxu2 %v1346_v8  ;;  %483 = vmatpush.msra.mxu3 %v1346_v8  ;;  %v210_v48 = vld [vmem:[%s209_s3] sm:$0x1]  ;;  %v248_v50 = vsel %vm139_vm0, %v198_v47, %v228_v46  ;;  %s213_s17 = scalar_lea.vmem [#allocation8], %s1024_s2  ;;  %s1028_s23 = sld [smem:[#allocation4 + $0x10]] }
  0x28   :  { %178 = vmatpush.msra.mxu0 %v1352_v9  ;;  %280 = vmatpush.msra.mxu1 %v1352_v9  ;;  %v214_v51 = vld [vmem:[%s213_s17] sm:$0x1]  ;;  %v234_v52 = vrot.slane %v210_v48, 5  ;;  %v249_v53 = vsel %vm141_vm1, %v248_v50, %v231_v49  ;;  %s217_s18 = scalar_lea.vmem [#allocation8], %s1025_s14  ;;  %s1031_s24 = sld [smem:[#allocation4 + $0x13]] }
  0x29   :  { %382 = vmatpush.msra.mxu2 %v1352_v9  ;;  %484 = vmatpush.msra.mxu3 %v1352_v9  ;;  %v218_v54 = vld [vmem:[%s217_s18] sm:$0x1]  ;;  %v237_v55 = vrot.slane %v214_v51, 4  ;;  %s221_s19 = scalar_lea.vmem [#allocation8], %s1026_s1  ;;  %s1032_s25 = sld [smem:[#allocation4 + $0x14]] }
  0x2a   :  { %179 = vmatpush.msra.mxu0 %v1358_v10  ;;  %281 = vmatpush.msra.mxu1 %v1358_v10  ;;  %v250_v56 = vsel %vm143_vm2, %v249_v53, %v234_v52  ;;  %v222_v57 = vld [vmem:[%s221_s19] sm:$0x1]  ;;  %v240_v58 = vrot.slane %v218_v54, 3  ;;  %s225_s20 = scalar_lea.vmem [#allocation8], %s1027_s16  ;;  %s1033_s27 = sld [smem:[#allocation4 + $0x15]] }
  0x2b   :  { %383 = vmatpush.msra.mxu2 %v1358_v10  ;;  %485 = vmatpush.msra.mxu3 %v1358_v10  ;;  %v251_v59 = vsel %vm145_vm3, %v250_v56, %v237_v55  ;;  %v226_v60 = vld [vmem:[%s225_s20] sm:$0x1]  ;;  %v243_v61 = vrot.slane %v222_v57, 2  ;;  %s303_s26 = scalar_lea.vmem [#allocation8], %s1029_s21  ;;  %s1034_s30 = sld [smem:[#allocation4 + $0x16]] }
  0x2c   :  { %180 = vmatpush.msra.mxu0 %v1364_v11  ;;  %282 = vmatpush.msra.mxu1 %v1364_v11  ;;  %v252_v62 = vsel %vm147_vm4, %v251_v59, %v240_v58  ;;  %v246_v63 = vrot.slane %v226_v60, 1  ;;  %s307_s28 = scalar_lea.vmem [#allocation8], %s1030_s22  ;;  %s1035_s7 = sld [smem:[#allocation4 + $0x17]] }
  0x2d   :  { %384 = vmatpush.msra.mxu2 %v1364_v11  ;;  %486 = vmatpush.msra.mxu3 %v1364_v11  ;;  %s299_s29 = scalar_lea.vmem [#allocation8], %s1028_s23  ;;  %s1037_s13 = sld [smem:[#allocation4 + $0x19]] }
  0x2e   :  { %181 = vmatpush.msra.mxu0 %v1370_v12  ;;  %283 = vmatpush.msra.mxu1 %v1370_v12  ;;  %s311_s0 = scalar_lea.vmem [#allocation8], %s1031_s24  ;;  %s1038_s14 = sld [smem:[#allocation4 + $0x1a]] }
  0x2f   :  { %385 = vmatpush.msra.mxu2 %v1370_v12  ;;  %487 = vmatpush.msra.mxu3 %v1370_v12  ;;  %s315_s10 = scalar_lea.vmem [#allocation8], %s1032_s25  ;;  %s1036_s15 = sld [smem:[#allocation4 + $0x18]] }
  0x30   :  { %182 = vmatpush.msra.mxu0 %v1376_v13  ;;  %284 = vmatpush.msra.mxu1 %v1376_v13  ;;  %s319_s11 = scalar_lea.vmem [#allocation8], %s1033_s27  ;;  %s1039_s4 = sld [smem:[#allocation4 + $0x1b]] }
  0x31   :  { %386 = vmatpush.msra.mxu2 %v1376_v13  ;;  %488 = vmatpush.msra.mxu3 %v1376_v13  ;;  %s323_s12 = scalar_lea.vmem [#allocation8], %s1034_s30  ;;  %s1040_s1 = sld [smem:[#allocation4 + $0x1c]] }
  0x32   :  { %183 = vmatpush.msra.mxu0 %v1382_v14  ;;  %285 = vmatpush.msra.mxu1 %v1382_v14  ;;  %v324_v19 = vld [vmem:[%s323_s12] sm:$0x1]  ;;  %s327_s2 = scalar_lea.vmem [#allocation8], %s1035_s7  ;;  %s1041_s16 = sld [smem:[#allocation4 + $0x1d]] }
  0x33   :  { %387 = vmatpush.msra.mxu2 %v1382_v14  ;;  %489 = vmatpush.msra.mxu3 %v1382_v14  ;;  %v328_v22 = vld [vmem:[%s327_s2] sm:$0x1]  ;;  %v345_v23 = vrot.slane %v324_v19, 2  ;;  %s405_s3 = scalar_lea.vmem [#allocation8], %s1037_s13  ;;  %s1042_s19 = sld [smem:[#allocation4 + $0x1e]] }
  0x34   :  { %184 = vmatpush.msra.mxu0 %v1388_v15  ;;  %286 = vmatpush.msra.mxu1 %v1388_v15  ;;  %v348_v25 = vrot.slane %v328_v22, 1  ;;  %v406_v32 = vld [vmem:[%s405_s3] sm:$0x1]  ;;  %s409_s17 = scalar_lea.vmem [#allocation8], %s1038_s14  ;;  %s1043_s21 = sld [smem:[#allocation4 + $0x1f]] }
  0x35   :  { %185 = vmatmul.f32.vlgmr.msra.gmra.mxu0 %v79_v16  ;;  %388 = vmatpush.msra.mxu2 %v1388_v15  ;;  %v320_v16 = vld [vmem:[%s319_s11] sm:$0x1]  ;;  %v432_v34 = vrot.slane %v406_v32, 7  ;;  %s401_s18 = scalar_lea.vmem [#allocation8], %s1036_s15  ;;  %s1046_s27 = sld [smem:[#allocation4 + $0x22]] }
  0x36   :  { %490 = vmatpush.msra.mxu3 %v1388_v15  ;;  %577 = vmatpush.msrb.mxu0 %v1304_v0  ;;  %v342_v20 = vrot.slane %v320_v16, 3  ;;  %v410_v33 = vld [vmem:[%s409_s17] sm:$0x1]  ;;  %s413_s20 = scalar_lea.vmem [#allocation8], %s1039_s4  ;;  %s1048_s30 = sld [smem:[#allocation4 + $0x24]] }
  0x37   :  { %679 = vmatpush.msrb.mxu1 %v1304_v0  ;;  %781 = vmatpush.msrb.mxu2 %v1304_v0  ;;  %v402_v35 = vld [vmem:[%s401_s18] sm:$0x1]  ;;  %v435_v37 = vrot.slane %v410_v33, 6  ;;  %s417_s22 = scalar_lea.vmem [#allocation8], %s1040_s1  ;;  %s1049_s7 = sld [smem:[#allocation4 + $0x25]] }
  0x38   :  { %578 = vmatpush.msrb.mxu0 %v1306_v1  ;;  %883 = vmatpush.msrb.mxu3 %v1304_v0  ;;  %v253_v0 = vsel %vm149_vm5, %v252_v62, %v243_v61  ;;  %v414_v36 = vld [vmem:[%s413_s20] sm:$0x1]  ;;  %s421_s23 = scalar_lea.vmem [#allocation8], %s1041_s16  ;;  %s1050_s12 = sld [smem:[#allocation4 + $0x26]] }
  0x39   :  { %680 = vmatpush.msrb.mxu1 %v1306_v1  ;;  %782 = vmatpush.msrb.mxu2 %v1306_v1  ;;  %s425_s24 = scalar_lea.vmem [#allocation8], %s1042_s19  ;;  %s1051_s13 = sld [smem:[#allocation4 + $0x27]] }
  0x3a   :  { %579 = vmatpush.msrb.mxu0 %v1310_v2  ;;  %884 = vmatpush.msrb.mxu3 %v1306_v1  ;;  %v254_v1 = vsel %vm151_vm6, %v253_v0, %v246_v63  ;;  %v426_v46 = vld [vmem:[%s425_s24] sm:$0x1]  ;;  %s429_s25 = scalar_lea.vmem [#allocation8], %s1043_s21  ;;  %s1053_s3 = sld [smem:[#allocation4 + $0x29]] }
  0x3b   :  { %681 = vmatpush.msrb.mxu1 %v1310_v2  ;;  %783 = vmatpush.msrb.mxu2 %v1310_v2  ;;  %v430_v49 = vld [vmem:[%s429_s25] sm:$0x1]  ;;  %v447_v50 = vrot.slane %v426_v46, 2  ;;  %s1054_s16 = sld [smem:[#allocation4 + $0x2a]] }
  0x3c   :  { %580 = vmatpush.msrb.mxu0 %v1316_v3  ;;  %885 = vmatpush.msrb.mxu3 %v1310_v2  ;;  %v450_v52 = vrot.slane %v430_v49, 1  ;;  %s519_s14 = scalar_lea.vmem [#allocation8], %s1048_s30  ;;  %s1052_s17 = sld [smem:[#allocation4 + $0x28]]  ;;  %v871_v49 = vld [vmem:[#allocation10 + $0x20] sm:$0xff] }
  0x3d   :  { %682 = vmatpush.msrb.mxu1 %v1316_v3  ;;  %784 = vmatpush.msrb.mxu2 %v1316_v3  ;;  %s523_s15 = scalar_lea.vmem [#allocation8], %s1049_s7  ;;  %s1055_s18 = sld [smem:[#allocation4 + $0x2b]] }
  0x3e   :  { %581 = vmatpush.msrb.mxu0 %v1322_v4  ;;  %886 = vmatpush.msrb.mxu3 %v1316_v3  ;;  %s527_s4 = scalar_lea.vmem [#allocation8], %s1050_s12  ;;  %s1056_s19 = sld [smem:[#allocation4 + $0x2c]] }
  0x3f   :  { %683 = vmatpush.msrb.mxu1 %v1322_v4  ;;  %785 = vmatpush.msrb.mxu2 %v1322_v4  ;;  %s531_s1 = scalar_lea.vmem [#allocation8], %s1051_s13  ;;  %s1057_s21 = sld [smem:[#allocation4 + $0x2d]] }
  0x40   :  { %582 = vmatpush.msrb.mxu0 %v1328_v5  ;;  %887 = vmatpush.msrb.mxu3 %v1322_v4  ;;  %s609_s20 = scalar_lea.vmem [#allocation8], %s1053_s3  ;;  %s1058_s24 = sld [smem:[#allocation4 + $0x2e]] }
  0x41   :  { %684 = vmatpush.msrb.mxu1 %v1328_v5  ;;  %786 = vmatpush.msrb.mxu2 %v1328_v5  ;;  %s1062_s7 = sld [smem:[#allocation4 + $0x32]] }
  0x42   :  { %583 = vmatpush.msrb.mxu0 %v1334_v6  ;;  %888 = vmatpush.msrb.mxu3 %v1328_v5  ;;  %s1064_s12 = sld [smem:[#allocation4 + $0x34]] }
  0x43   :  { %685 = vmatpush.msrb.mxu1 %v1334_v6  ;;  %787 = vmatpush.msrb.mxu2 %v1334_v6  ;;  %s617_s25 = scalar_lea.vmem [#allocation8], %s1055_s18  ;;  %s1065_s13 = sld [smem:[#allocation4 + $0x35]] }
  0x44   :  { %584 = vmatpush.msrb.mxu0 %v1340_v7  ;;  %889 = vmatpush.msrb.mxu3 %v1334_v6  ;;  %v304_v6 = vld [vmem:[%s303_s26] sm:$0x1]  ;;  %s1045_s26 = sld [smem:[#allocation4 + $0x21]] }
  0x45   :  { %686 = vmatpush.msrb.mxu1 %v1340_v7  ;;  %788 = vmatpush.msrb.mxu2 %v1340_v7  ;;  %s1067_s3 = sld [smem:[#allocation4 + $0x37]] }
  0x46   :  { %585 = vmatpush.msrb.mxu0 %v1346_v8  ;;  %890 = vmatpush.msrb.mxu3 %v1340_v7  ;;  %v308_v7 = vld [vmem:[%s307_s28] sm:$0x1]  ;;  %s1044_s28 = sld [smem:[#allocation4 + $0x20]] }
  0x47   :  { %687 = vmatpush.msrb.mxu1 %v1346_v8  ;;  %789 = vmatpush.msrb.mxu2 %v1346_v8 }
  0x48   :  { %586 = vmatpush.msrb.mxu0 %v1352_v9  ;;  %891 = vmatpush.msrb.mxu3 %v1346_v8  ;;  %v330_v8 = vrot.slane %v304_v6, 7 }
  0x49   :  { %688 = vmatpush.msrb.mxu1 %v1352_v9  ;;  %790 = vmatpush.msrb.mxu2 %v1352_v9 }
  0x4a   :  { %587 = vmatpush.msrb.mxu0 %v1358_v10  ;;  %892 = vmatpush.msrb.mxu3 %v1352_v9  ;;  %v300_v9 = vld [vmem:[%s299_s29] sm:$0x1]  ;;  %s1047_s29 = sld [smem:[#allocation4 + $0x23]] }
  0x4b   :  { %689 = vmatpush.msrb.mxu1 %v1358_v10  ;;  %791 = vmatpush.msrb.mxu2 %v1358_v10  ;;  %v312_v10 = vld [vmem:[%s311_s0] sm:$0x1]  ;;  %s507_s0 = scalar_lea.vmem [#allocation8], %s1045_s26  ;;  %s1059_s26 = sld [smem:[#allocation4 + $0x2f]] }
  0x4c   :  { %588 = vmatpush.msrb.mxu0 %v1364_v11  ;;  %v508_v59 = vld [vmem:[%s507_s0] sm:$0x1]  ;;  %s503_s11 = scalar_lea.vmem [#allocation8], %s1044_s28  ;;  %s625_s28 = scalar_lea.vmem [#allocation8], %s1057_s21 }
  0x4d   :  { %690 = vmatpush.msrb.mxu1 %v1364_v11  ;;  %792 = vmatpush.msrb.mxu2 %v1364_v11  ;;  %v333_v11 = vrot.slane %v308_v7, 6  ;;  %v534_v61 = vrot.slane %v508_v59, 7  ;;  %v504_v62 = vld [vmem:[%s503_s11] sm:$0x1]  ;;  %s1061_s0 = sld [smem:[#allocation4 + $0x31]] }
  0x4e   :  { %589 = vmatpush.msrb.mxu0 %v1370_v12  ;;  %s1063_s11 = sld [smem:[#allocation4 + $0x33]] }
  0x4f   :  { %691 = vmatpush.msrb.mxu1 %v1370_v12  ;;  %793 = vmatpush.msrb.mxu2 %v1370_v12  ;;  %v350_v12 = vsel %vm139_vm0, %v300_v9, %v330_v8  ;;  %v528_v8 = vld [vmem:[%s527_s4] sm:$0x1]  ;;  %s1066_s4 = sld [smem:[#allocation4 + $0x36]] }
  0x50   :  { %590 = vmatpush.msrb.mxu0 %v1376_v13  ;;  %s515_s2 = scalar_lea.vmem [#allocation8], %s1047_s29  ;;  %s629_s29 = scalar_lea.vmem [#allocation8], %s1058_s24 }
  0x51   :  { %692 = vmatpush.msrb.mxu1 %v1376_v13  ;;  %794 = vmatpush.msrb.mxu2 %v1376_v13  ;;  %v316_v13 = vld [vmem:[%s315_s10] sm:$0x1]  ;;  %s511_s10 = scalar_lea.vmem [#allocation8], %s1046_s27  ;;  %s621_s27 = scalar_lea.vmem [#allocation8], %s1056_s19 }
  0x52   :  { %591 = vmatpush.msrb.mxu0 %v1382_v14  ;;  %v339_v17 = vrot.slane %v316_v13, 4  ;;  %v512_v60 = vld [vmem:[%s511_s10] sm:$0x1]  ;;  %s633_s30 = scalar_lea.vmem [#allocation8], %s1059_s26  ;;  %s1060_s10 = sld [smem:[#allocation4 + $0x30]] }
  0x53   :  { %693 = vmatpush.msrb.mxu1 %v1382_v14  ;;  %795 = vmatpush.msrb.mxu2 %v1382_v14  ;;  %v336_v14 = vrot.slane %v312_v10, 5  ;;  %v516_v63 = vld [vmem:[%s515_s2] sm:$0x1]  ;;  %v537_v0 = vrot.slane %v512_v60, 6  ;;  %s711_s2 = scalar_lea.vmem [#allocation8], %s1061_s0  ;;  %s735_s19 = scalar_lea.vmem [#allocation8], %s1067_s3 }
  0x54   :  { %592 = vmatpush.msrb.mxu0 %v1388_v15  ;;  %s1070_s21 = sld [smem:[#allocation4 + $0x3a]] }
  0x55   :  { %694 = vmatpush.msrb.mxu1 %v1388_v15  ;;  %796 = vmatpush.msrb.mxu2 %v1388_v15  ;;  %v351_v15 = vsel %vm141_vm1, %v350_v12, %v333_v11  ;;  %v532_v11 = vld [vmem:[%s531_s1] sm:$0x1]  ;;  %v549_v12 = vrot.slane %v528_v8, 2  ;;  %s719_s1 = scalar_lea.vmem [#allocation8], %s1063_s11  ;;  %s731_s18 = scalar_lea.vmem [#allocation8], %s1066_s4 }
  0x56   :  { %v352_v18 = vsel %vm143_vm2, %v351_v15, %v336_v14  ;;  %v552_v14 = vrot.slane %v532_v11, 1  ;;  %s1072_s24 = sld [smem:[#allocation4 + $0x3c]]  ;;  %s919_s4 = sshll.u32 %s1541_s5, 4  ;;  %s920_s4 = int_to_ptr.hbm [resolvable:$true] %s919_s4 }
  0x57   :  { %v353_v21 = vsel %vm145_vm3, %v352_v18, %v339_v17  ;;  %s1073_s26 = sld [smem:[#allocation4 + $0x3d]] }
  0x58   :  { %v354_v24 = vsel %vm147_vm4, %v353_v21, %v342_v20  ;;  %v610_v21 = vld [vmem:[%s609_s20] sm:$0x1]  ;;  %s1069_s20 = sld [smem:[#allocation4 + $0x39]] }
  0x59   :  { %v355_v26 = vsel %vm149_vm5, %v354_v24, %v345_v23  ;;  %v636_v23 = vrot.slane %v610_v21, 7  ;;  %s1075_s0 = sld [smem:[#allocation4 + $0x3f]] }
  0x5a   :  { %v356_v27 = vsel %vm151_vm6, %v355_v26, %v348_v25  ;;  %v618_v25 = vld [vmem:[%s617_s25] sm:$0x1] }
  0x5e   :  { %s813_s25 = scalar_lea.vmem [#allocation8], %s1069_s20 }
  0xb2   :  { %v186_v40 = vpop.f32.mrf.mxu0 }
  0xb3   :  { %v189_v41 = vadd.f32 %v186_v40, %v152_v38  ;;  %v452_v38 = vsel %vm139_vm0, %v402_v35, %v432_v34  ;;  %v418_v40 = vld [vmem:[%s417_s22] sm:$0x1]  ;;  %s613_s22 = scalar_lea.vmem [#allocation8], %s1054_s16  ;;  %s723_s16 = scalar_lea.vmem [#allocation8], %s1064_s12 }
  0xb4   :  { %v441_v44 = vrot.slane %v418_v40, 4  ;;  %v614_v22 = vld [vmem:[%s613_s22] sm:$0x1]  ;;  %s1068_s22 = sld [smem:[#allocation4 + $0x38]]  ;;  %s837_s12 = scalar_lea.vmem [#allocation8], %s1075_s0 }
  0xb5   :  { %v190_v42 = vadd.f32 %v1468_v39, %v189_v41  ;;  %v438_v41 = vrot.slane %v414_v36, 5  ;;  %v639_v26 = vrot.slane %v614_v22, 6  ;;  %v630_v34 = vld [vmem:[%s629_s29] sm:$0x1]  ;;  %s1074_s29 = sld [smem:[#allocation4 + $0x3e]] }
  0xb7   :  { %1085 = vtanh.f32 %v190_v42  ;;  %v453_v42 = vsel %vm141_vm1, %v452_v38, %v435_v37  ;;  %v634_v37 = vld [vmem:[%s633_s30] sm:$0x1]  ;;  %v651_v38 = vrot.slane %v630_v34, 2 }
  0xb8   :  { %v454_v45 = vsel %vm143_vm2, %v453_v42, %v438_v41  ;;  %v654_v41 = vrot.slane %v634_v37, 1 }
  0xb9   :  { %v455_v48 = vsel %vm145_vm3, %v454_v45, %v441_v44 }
  0xbb   :  { %s833_s11 = scalar_lea.vmem [#allocation8], %s1074_s29 }
  0xbd   :  { %v1086_v43 = vpop.eup %1085 }
  0xbe   :  { %192 = vst [vmem:[#allocation11] sm:$0xff] %v1086_v43  ;;  %287 = vmatmul.f32.vlgmr.msra.gmra.mxu1 %v1086_v43  ;;  %v422_v43 = vld [vmem:[%s421_s23] sm:$0x1]  ;;  %s605_s23 = scalar_lea.vmem [#allocation8], %s1052_s17  ;;  %s727_s17 = scalar_lea.vmem [#allocation8], %s1065_s13 }
  0xbf   :  { %v444_v47 = vrot.slane %v422_v43, 3  ;;  %v606_v24 = vld [vmem:[%s605_s23] sm:$0x1]  ;;  %s1071_s23 = sld [smem:[#allocation4 + $0x3b]] }
  0xc1   :  { %v456_v51 = vsel %vm147_vm4, %v455_v48, %v444_v47  ;;  %v872_v48 = vld [vmem:[#allocation10 + $0x28] sm:$0xff] }
  0xc2   :  { %v457_v53 = vsel %vm149_vm5, %v456_v51, %v447_v50  ;;  %893 = vmatpush.msrb.mxu3 %v872_v48  ;;  %v870_v50 = vld [vmem:[#allocation10 + $0x18] sm:$0xff] }
  0xc3   :  { %v458_v54 = vsel %vm151_vm6, %v457_v53, %v450_v52  ;;  %v712_v51 = vld [vmem:[%s711_s2] sm:$0x1]  ;;  %v869_v52 = vld [vmem:[#allocation10 + $0x10] sm:$0xff]  ;;  %s1249_s2 = smov [#allocation11]  }
  0xc4   :  { %894 = vmatpush.msrb.mxu3 %v871_v49  ;;  %s917_s13 = sshll.u32 %s1249_s2, 4  ;;  %s918_s13 = int_to_ptr.vmem [resolvable:$true] %s917_s13 }
  0xc5   :  { %s821_s30 = scalar_lea.vmem [#allocation8], %s1071_s23 }
  0xc6   :  { %895 = vmatpush.msrb.mxu3 %v870_v50 }
  0xc8   :  { %896 = vmatpush.msrb.mxu3 %v869_v52 }
 0x13b   :  { %v288_v2 = vpop.f32.mrf.mxu1 }
 0x13c   :  { %v291_v3 = vadd.f32 %v288_v2, %v254_v1  ;;  %v554_v1 = vsel %vm139_vm0, %v504_v62, %v534_v61  ;;  %v520_v2 = vld [vmem:[%s519_s14] sm:$0x1]  ;;  %s715_s14 = scalar_lea.vmem [#allocation8], %s1062_s7  ;;  %s825_s7 = scalar_lea.vmem [#allocation8], %s1072_s24 }
 0x13d   :  { %v543_v6 = vrot.slane %v520_v2, 4  ;;  %v716_v53 = vld [vmem:[%s715_s14] sm:$0x1] }
 0x13e   :  { %v292_v4 = vadd.f32 %v1468_v39, %v291_v3  ;;  %v540_v3 = vrot.slane %v516_v63, 5  ;;  %v741_v59 = vrot.slane %v716_v53, 6  ;;  %v724_v61 = vld [vmem:[%s723_s16] sm:$0x1] }
 0x140   :  { %1087 = vtanh.f32 %v292_v4  ;;  %v555_v4 = vsel %vm141_vm1, %v554_v1, %v537_v0  ;;  %v728_v0 = vld [vmem:[%s727_s17] sm:$0x1]  ;;  %v747_v1 = vrot.slane %v724_v61, 4 }
 0x141   :  { %v556_v7 = vsel %vm143_vm2, %v555_v4, %v540_v3  ;;  %v732_v3 = vld [vmem:[%s731_s18] sm:$0x1]  ;;  %v750_v4 = vrot.slane %v728_v0, 3  ;;  %s933_s18 = sshll.u32 %s1542_s6, 4  ;;  %s934_s18 = int_to_ptr.hbm [resolvable:$true] %s933_s18 }
 0x142   :  { %v557_v10 = vsel %vm145_vm3, %v556_v7, %v543_v6  ;;  %v736_v6 = vld [vmem:[%s735_s19] sm:$0x1]  ;;  %v753_v7 = vrot.slane %v732_v3, 2 }
 0x146   :  { %v1088_v5 = vpop.eup %1087 }
 0x147   :  { %295 = vst [vmem:[#allocation11 + $0x8] sm:$0xff] %v1088_v5  ;;  %389 = vmatmul.f32.vlgmr.msra.gmra.mxu2 %v1088_v5  ;;  %v524_v5 = vld [vmem:[%s523_s15] sm:$0x1]  ;;  %s707_s15 = scalar_lea.vmem [#allocation8], %s1060_s10  ;;  %s829_s10 = scalar_lea.vmem [#allocation8], %s1073_s26 }
 0x148   :  { %v546_v9 = vrot.slane %v524_v5, 3 }
 0x14a   :  { %v558_v13 = vsel %vm147_vm4, %v557_v10, %v546_v9  ;;  %v756_v9 = vrot.slane %v736_v6, 1 }
 0x14b   :  { %v559_v15 = vsel %vm149_vm5, %v558_v13, %v549_v12 }
 0x14c   :  { %v560_v16 = vsel %vm151_vm6, %v559_v15, %v552_v14 }
 0x1ca   :  { %v390_v28 = vpop.f32.mrf.mxu2 }
 0x1cb   :  { %v393_v29 = vadd.f32 %v390_v28, %v356_v27  ;;  %v656_v27 = vsel %vm139_vm0, %v606_v24, %v636_v23  ;;  %v622_v28 = vld [vmem:[%s621_s27] sm:$0x1]  ;;  %s817_s27 = scalar_lea.vmem [#allocation8], %s1070_s21 }
 0x1cc   :  { %v645_v32 = vrot.slane %v622_v28, 4  ;;  %v826_v23 = vld [vmem:[%s825_s7] sm:$0x1] }
 0x1cd   :  { %v394_v30 = vadd.f32 %v1468_v39, %v393_v29  ;;  %v642_v29 = vrot.slane %v618_v25, 5 }
 0x1cf   :  { %1089 = vtanh.f32 %v394_v30  ;;  %v657_v30 = vsel %vm141_vm1, %v656_v27, %v639_v26  ;;  %v830_v26 = vld [vmem:[%s829_s10] sm:$0x1]  ;;  %v849_v27 = vrot.slane %v826_v23, 4 }
 0x1d0   :  { %v658_v33 = vsel %vm143_vm2, %v657_v30, %v642_v29  ;;  %v834_v29 = vld [vmem:[%s833_s11] sm:$0x1]  ;;  %v852_v30 = vrot.slane %v830_v26, 3 }
 0x1d1   :  { %v659_v36 = vsel %vm145_vm3, %v658_v33, %v645_v32  ;;  %v838_v32 = vld [vmem:[%s837_s12] sm:$0x1]  ;;  %v855_v33 = vrot.slane %v834_v29, 2 }
 0x1d5   :  { %v1090_v31 = vpop.eup %1089 }
 0x1d6   :  { %397 = vst [vmem:[#allocation11 + $0x10] sm:$0xff] %v1090_v31  ;;  %491 = vmatmul.f32.vlgmr.msra.gmra.mxu3 %v1090_v31  ;;  %v626_v31 = vld [vmem:[%s625_s28] sm:$0x1]  ;;  %s809_s28 = scalar_lea.vmem [#allocation8], %s1068_s22 }
 0x1d7   :  { %v648_v35 = vrot.slane %v626_v31, 3 }
 0x1d9   :  { %v660_v40 = vsel %vm147_vm4, %v659_v36, %v648_v35  ;;  %v858_v35 = vrot.slane %v838_v32, 1 }
 0x1da   :  { %v661_v42 = vsel %vm149_vm5, %v660_v40, %v651_v38 }
 0x1db   :  { %v662_v43 = vsel %vm151_vm6, %v661_v42, %v654_v41 }
 0x259   :  { %v492_v55 = vpop.f32.mrf.mxu3 }
 0x25a   :  { %v495_v56 = vadd.f32 %v492_v55, %v458_v54  ;;  %v738_v54 = vrot.slane %v712_v51, 7  ;;  %v868_v55 = vld [vmem:[#allocation10 + $0x8] sm:$0xff] }
 0x25b   :  { %897 = vmatpush.msrb.mxu3 %v868_v55 }
 0x25c   :  { %v496_v57 = vadd.f32 %v1468_v39, %v495_v56  ;;  %v708_v56 = vld [vmem:[%s707_s15] sm:$0x1] }
 0x25d   :  { %v758_v60 = vsel %vm139_vm0, %v708_v56, %v738_v54 }
 0x25e   :  { %1091 = vtanh.f32 %v496_v57  ;;  %v867_v57 = vld [vmem:[#allocation10] sm:$0xff]  ;;  %v759_v63 = vsel %vm141_vm1, %v758_v60, %v741_v59 }
 0x25f   :  { %898 = vmatpush.msrb.mxu3 %v867_v57 }
 0x264   :  { %v1092_v58 = vpop.eup %1091 }
 0x265   :  { %499 = vst [vmem:[#allocation11 + $0x18] sm:$0xff] %v1092_v58  ;;  %593 = vmatmul.f32.vlgmr.msrb.gmra.mxu0 %v1092_v58  ;;  %v720_v58 = vld [vmem:[%s719_s1] sm:$0x1]  ;;  %s1250_s1 = smov [#allocation12]  }
 0x266   :  { %v744_v62 = vrot.slane %v720_v58, 5  ;;  %s931_s3 = sshll.u32 %s1250_s1, 4  ;;  %s932_s3 = int_to_ptr.vmem [resolvable:$true] %s931_s3 }
 0x268   :  { %v760_v2 = vsel %vm143_vm2, %v759_v63, %v744_v62 }
 0x269   :  { %v761_v5 = vsel %vm145_vm3, %v760_v2, %v747_v1 }
 0x26a   :  { %v762_v8 = vsel %vm147_vm4, %v761_v5, %v750_v4 }
 0x26b   :  { %v763_v10 = vsel %vm149_vm5, %v762_v8, %v753_v7 }
 0x26c   :  { %v764_v11 = vsel %vm151_vm6, %v763_v10, %v756_v9 }
 0x2e2   :  { %v594_v17 = vpop.f32.mrf.mxu0 }
 0x2e3   :  { %v597_v18 = vadd.f32 %v594_v17, %v560_v16  ;;  %v814_v16 = vld [vmem:[%s813_s25] sm:$0x1] }
 0x2e4   :  { %v818_v17 = vld [vmem:[%s817_s27] sm:$0x1] }
 0x2e5   :  { %v598_v19 = vadd.f32 %v1468_v39, %v597_v18  ;;  %v840_v18 = vrot.slane %v814_v16, 7  ;;  %v843_v21 = vrot.slane %v818_v17, 6 }
 0x2e7   :  { %1093 = vtanh.f32 %v598_v19  ;;  %v810_v19 = vld [vmem:[%s809_s28] sm:$0x1] }
 0x2e8   :  { %v860_v22 = vsel %vm139_vm0, %v810_v19, %v840_v18 }
 0x2e9   :  { %v861_v25 = vsel %vm141_vm1, %v860_v22, %v843_v21 }
 0x2ed   :  { %v1094_v20 = vpop.eup %1093 }
 0x2ee   :  { %601 = vst [vmem:[#allocation11 + $0x20] sm:$0xff] %v1094_v20  ;;  %695 = vmatmul.f32.vlgmr.msrb.gmra.mxu1 %v1094_v20  ;;  %v822_v20 = vld [vmem:[%s821_s30] sm:$0x1] }
 0x2ef   :  { %v846_v24 = vrot.slane %v822_v20, 5 }
 0x2f1   :  { %v862_v28 = vsel %vm143_vm2, %v861_v25, %v846_v24 }
 0x2f2   :  { %v863_v31 = vsel %vm145_vm3, %v862_v28, %v849_v27 }
 0x2f3   :  { %v864_v34 = vsel %vm147_vm4, %v863_v31, %v852_v30 }
 0x2f4   :  { %v865_v36 = vsel %vm149_vm5, %v864_v34, %v855_v33 }
 0x2f5   :  { %v866_v37 = vsel %vm151_vm6, %v865_v36, %v858_v35 }
 0x36b   :  { %v696_v44 = vpop.f32.mrf.mxu1 }
 0x36c   :  { %v699_v45 = vadd.f32 %v696_v44, %v662_v43 }
 0x36e   :  { %v700_v46 = vadd.f32 %v1468_v39, %v699_v45 }
 0x370   :  { %1095 = vtanh.f32 %v700_v46 }
 0x376   :  { %v1096_v47 = vpop.eup %1095 }
 0x377   :  { %703 = vst [vmem:[#allocation11 + $0x28] sm:$0xff] %v1096_v47  ;;  %797 = vmatmul.f32.vlgmr.msrb.gmra.mxu2 %v1096_v47 }
 0x3fa   :  { %v798_v12 = vpop.f32.mrf.mxu2 }
 0x3fb   :  { %v801_v13 = vadd.f32 %v798_v12, %v764_v11 }
 0x3fd   :  { %v802_v14 = vadd.f32 %v1468_v39, %v801_v13 }
 0x3ff   :  { %1097 = vtanh.f32 %v802_v14 }
 0x405   :  { %v1098_v15 = vpop.eup %1097 }
 0x406   :  { %805 = vst [vmem:[#allocation11 + $0x30] sm:$0xff] %v1098_v15  ;;  %899 = vmatmul.f32.vlgmr.msrb.gmra.mxu3 %v1098_v15 }
 0x489   :  { %v900_v38 = vpop.f32.mrf.mxu3 }
 0x48a   :  { %v903_v40 = vadd.f32 %v900_v38, %v866_v37 }
 0x48c   :  { %v904_v41 = vadd.f32 %v1468_v39, %v903_v40 }
 0x48e   :  { %1099 = vtanh.f32 %v904_v41 }
 0x494   :  { %v1100_v42 = vpop.eup %1099 }
 0x495   :  { %907 = vst [vmem:[#allocation11 + $0x38] sm:$0xff] %v1100_v42 }
 0x496   :  { %912 = vst [vmem:[#allocation12] sm:$0xff] %v1100_v42  ;;  %925 = dma.vmem_to_hbm [thread:$0]  %s918_s13, 1024, %s920_s4, [#allocation7], %s1245_s8, %s1245_s8, %s1246_s9  }
 0x497   :  { %936 = dma.vmem_to_hbm [thread:$0]  %s932_s3, 128, %s934_s18, [#allocation13]  }
 0x498   :  { %1239 = dma.done.wait [#allocation7], 1024  }
 0x499   :  { %1240 = vsyncadd [#allocation7], 4294966272 }
 0x49a   :  { %1241 = dma.done.wait [#allocation13], 128  }
 0x49b   :  { %1242 = vsyncadd [#allocation13], 4294967168 }
 0x49c   :  { %945 = vsyncpa [#allocation6], 1 }
 0x49d   :  { %946 = vsyncpa [#allocation9], 1 }
 0x49e   :  { %947 = vsyncpa [#allocation7], 1 }
 0x49f   :  { %948 = vsyncpa [#allocation13], 1 }

</bundles_post_ra>
